<compile_context>
chip_gen: v6e
topology: v6e:2x2x1
jax: 0.10.0
libtpu: 0.0.40
codegen_flags: <defaults>
</compile_context>

<pallas_src>
import numpy as np
import jax
import jax.numpy as jnp
from jax import lax
from jax.experimental import pallas as pl
from jax.experimental.pallas import tpu as pltpu

KSIZE = 7
PAD = 3


def spatial_attention_kernel(xf_ref, w1_ref, b1_ref, w2_ref, b2_ref,
                             out_ref, midpad_ref):
    """One batch element per grid step. Flattened lane-dense layout.

    xf_ref     : (1, H+6, W*Cin)     input, H zero-padded by 3, (W,C) folded
    w1_ref     : (7, W*Cin, W*Cmid)  bf16 conv1 Toeplitz weights (kx taps +
                                     W-padding + BN1 scale folded in)
    b1_ref     : (1, W*Cmid)  f32    BN1 shift, tiled over W
    w2_ref     : (7, W*Cmid, W*Cout) bf16 conv2 Toeplitz weights (BN2 scale folded)
    b2_ref     : (1, W*Cout)  f32    BN2 shift, tiled over W
    out_ref    : (1, H, W*Cout)      x * sigmoid(attention), lane-dense
    midpad_ref : VMEM (H+6, W*Cmid)  f32 scratch for the H-padded ReLU activation
    """
    H = out_ref.shape[1]
    WCmid = w1_ref.shape[2]
    WCout = out_ref.shape[2]

    xf = xf_ref[0]                                      # (H+6, W*Cin) f32

    # ---- conv1 (+ folded BN1 scale): 7 MXU matmuls, K = W*Cin ----
    acc1 = jnp.zeros((H, WCmid), jnp.float32)
    for ky in range(KSIZE):
        slab = xf[ky:ky + H, :].astype(jnp.bfloat16)    # sublane shift only
        acc1 = acc1 + jnp.dot(slab, w1_ref[ky],
                              preferred_element_type=jnp.float32)
    mid = jnp.maximum(acc1 + b1_ref[...], 0.0)          # BN1 shift + ReLU (f32)

    # H-pad the intermediate into VMEM scratch (W padding is folded into w2).
    # Zero-fill every step: with "parallel" semantics the grid may split across
    # TensorCores (v7x) and each core owns its scratch, so a program_id==0
    # one-time init is not safe. The buffer is only (H+6)*W*Cmid f32 (~11 KB),
    # 8x smaller than before, so this is negligible vst work.
    midpad_ref[...] = jnp.zeros_like(midpad_ref)
    midpad_ref[PAD:PAD + H, :] = mid

    # ---- conv2 (+ folded BN2 scale): 7 MXU matmuls, K = W*Cmid ----
    acc2 = jnp.zeros((H, WCout), jnp.float32)
    for ky in range(KSIZE):
        slab = midpad_ref[ky:ky + H, :].astype(jnp.bfloat16)
        acc2 = acc2 + jnp.dot(slab, w2_ref[ky],
                              preferred_element_type=jnp.float32)

    att = jax.nn.sigmoid(acc2 + b2_ref[...])            # BN2 shift + sigmoid (f32)

    # out = x * attention, computed directly in the lane-dense (H, W*C) layout
    # (Cin == Cout so the flattened layouts line up elementwise). No relayout.
    out_ref[0] = xf[PAD:PAD + H, :] * att


def spatial_attention(x_nchw, kernel_params):
    """x_nchw: (N, C, H, W) float32, same interface as the PyTorch module."""
    w1big, b1t, w2big, b2t = kernel_params
    N, Cin, H, W = x_nchw.shape
    Hp = H + 2 * PAD
    WCin = W * Cin
    WCmid = w1big.shape[2]
    WCout = w2big.shape[2]
    Cout = WCout // W
    assert w1big.shape[1] == WCin
    assert Cout == Cin, "x * att requires out_channels == in_channels"

    # NCHW -> NHWC, zero-pad H by 3, fold (W, C) into one lane-dense axis.
    x_nhwc = jnp.transpose(x_nchw, (0, 2, 3, 1)).astype(jnp.float32)
    xf = jnp.pad(x_nhwc, ((0, 0), (PAD, PAD), (0, 0), (0, 0))).reshape(N, Hp, WCin)

    # NOTE: weights/shifts have constant index_maps; Pallas skips re-DMA when
    # the block index is unchanged. pl.Buffered(1) would also drop their
    # double-buffer, but the VMEM saving is tiny at these sizes.
    out_flat = pl.pallas_call(
        spatial_attention_kernel,
        out_shape=jax.ShapeDtypeStruct((N, H, WCout), jnp.float32),
        grid_spec=pltpu.PrefetchScalarGridSpec(
            num_scalar_prefetch=0,
            grid=(N,),
            in_specs=[
                pl.BlockSpec((1, Hp, WCin), lambda n: (n, 0, 0)),
                pl.BlockSpec((KSIZE, WCin, WCmid), lambda n: (0, 0, 0)),
                pl.BlockSpec((1, WCmid), lambda n: (0, 0)),
                pl.BlockSpec((KSIZE, WCmid, WCout), lambda n: (0, 0, 0)),
                pl.BlockSpec((1, WCout), lambda n: (0, 0)),
            ],
            out_specs=pl.BlockSpec((1, H, WCout), lambda n: (n, 0, 0)),
            scratch_shapes=[pltpu.VMEM((Hp, WCmid), jnp.float32)],
        ),
        compiler_params=pltpu.CompilerParams(
            dimension_semantics=("parallel",)),
    )(xf, w1big, b1t, w2big, b2t)

    out = out_flat.reshape(N, H, W, Cout)
    return jnp.transpose(out, (0, 3, 1, 2))


def _build_toeplitz(w_hwio, W):
    """Fold kx taps and W zero-padding into a per-ky block-Toeplitz matrix.

    w_hwio: (7, 7, Cin, Cout) numpy -> (7, W*Cin, W*Cout) where
    big[ky, w*Cin+ci, x*Cout+co] = w[ky, w-x+PAD, ci, co] (0 if tap out of range).
    """
    K, _, Cin, Cout = w_hwio.shape
    big = np.zeros((K, W * Cin, W * Cout), np.float32)
    for x in range(W):
        for kx in range(K):
            col = x + kx - PAD
            if 0 <= col < W:
                big[:, col * Cin:(col + 1) * Cin, x * Cout:(x + 1) * Cout] = \
                    w_hwio[:, kx]
    return big


def prepare_kernel_params(params, W):
    """Fold BN scales into Toeplitz conv weights (bf16), tile shifts over W."""
    w1, s1, b1, w2, s2, b2 = params
    w1 = np.asarray(w1, np.float32) * np.asarray(s1, np.float32)[None, None, None, :]
    w2 = np.asarray(w2, np.float32) * np.asarray(s2, np.float32)[None, None, None, :]
    w1big = jnp.asarray(_build_toeplitz(w1, W), jnp.bfloat16)
    w2big = jnp.asarray(_build_toeplitz(w2, W), jnp.bfloat16)
    b1t = jnp.asarray(np.tile(np.asarray(b1, np.float32), W).reshape(1, -1))
    b2t = jnp.asarray(np.tile(np.asarray(b2, np.float32), W).reshape(1, -1))
    return (w1big, b1t, w2big, b2t)


def init_params(key, in_channels=32, out_channels=32, rate=4):
    """Deterministic synthetic parameters; BN folded (eval mode) to scale/shift."""
    mid = in_channels // rate
    eps = 1e-5
    k = jax.random.split(key, 10)

    w1 = 0.05 * jax.random.normal(k[0], (KSIZE, KSIZE, in_channels, mid), jnp.float32)
    bias1 = 0.05 * jax.random.normal(k[1], (mid,), jnp.float32)
    gamma1 = 1.0 + 0.1 * jax.random.normal(k[2], (mid,), jnp.float32)
    beta1 = 0.1 * jax.random.normal(k[3], (mid,), jnp.float32)
    mean1 = 0.05 * jax.random.normal(k[4], (mid,), jnp.float32)
    var1 = 1.0 + 0.1 * jnp.abs(jax.random.normal(k[5], (mid,), jnp.float32))

    w2 = 0.05 * jax.random.normal(k[6], (KSIZE, KSIZE, mid, out_channels), jnp.float32)
    bias2 = 0.05 * jax.random.normal(k[7], (out_channels,), jnp.float32)
    gamma2 = 1.0 + 0.1 * jax.random.normal(k[8], (out_channels,), jnp.float32)
    beta2 = 0.1 * jax.random.normal(k[9], (out_channels,), jnp.float32)
    mean2 = jnp.zeros((out_channels,), jnp.float32)
    var2 = jnp.ones((out_channels,), jnp.float32)

    # fold:  BN(conv(x) + bias) = scale * conv(x) + (scale*(bias-mean) + beta)
    scale1 = gamma1 / jnp.sqrt(var1 + eps)
    shift1 = scale1 * (bias1 - mean1) + beta1
    scale2 = gamma2 / jnp.sqrt(var2 + eps)
    shift2 = scale2 * (bias2 - mean2) + beta2

    return (w1, scale1, shift1, w2, scale2, shift2)


def reference(x_nchw, params):
    """Pure-JAX f32 reference (lax.conv) with the same folded BN parameters."""
    w1, s1, b1, w2, s2, b2 = params
    Cmid = w1.shape[-1]
    Cout = w2.shape[-1]
    dn = ('NHWC', 'HWIO', 'NHWC')
    x = jnp.transpose(x_nchw, (0, 2, 3, 1))
    z1 = lax.conv_general_dilated(x, w1, (1, 1), [(PAD, PAD), (PAD, PAD)],
                                  dimension_numbers=dn)
    a1 = jnp.maximum(z1 * s1.reshape(1, 1, 1, Cmid) + b1.reshape(1, 1, 1, Cmid), 0.0)
    z2 = lax.conv_general_dilated(a1, w2, (1, 1), [(PAD, PAD), (PAD, PAD)],
                                  dimension_numbers=dn)
    att = jax.nn.sigmoid(z2 * s2.reshape(1, 1, 1, Cout) + b2.reshape(1, 1, 1, Cout))
    return jnp.transpose(x * att, (0, 3, 1, 2))


if __name__ == "__main__":
    key = jax.random.PRNGKey(0)
    kx_, kp = jax.random.split(key)

    N, C, H, W = 2, 32, 16, 16          # in_channels=out_channels=32, rate=4
    x = jax.random.normal(kx_, (N, C, H, W), jnp.float32)
    params = init_params(kp, in_channels=C, out_channels=C, rate=4)
    kparams = prepare_kernel_params(params, W)

    out = spatial_attention(x, kparams)
    out = jax.block_until_ready(out)

    ref = reference(x, params)
    assert out.shape == (N, C, H, W)
    err = float(jnp.max(jnp.abs(out - ref)))
    # bf16 MXU operands (f32 accumulation) => looser tolerance than pure f32.
    assert jnp.allclose(out, ref, rtol=5e-2, atol=5e-2), f"max abs err {err}"
    print("KERNEL_OK")
</pallas_src>

<mosaic_0001>
module attributes {stable_mosaic.version = 11 : i64} {
  func.func @spatial_attention_kernel(%arg0: i32, %arg1: memref<1x22x512xf32, #tpu.memory_space<vmem>>, %arg2: memref<7x512x128xbf16, #tpu.memory_space<vmem>>, %arg3: memref<1x128xf32, #tpu.memory_space<vmem>>, %arg4: memref<7x128x512xbf16, #tpu.memory_space<vmem>>, %arg5: memref<1x512xf32, #tpu.memory_space<vmem>>, %arg6: memref<1x16x512xf32, #tpu.memory_space<vmem>>, %arg7: memref<22x128xf32, #tpu.memory_space<vmem>>) attributes {dimension_semantics = [#tpu.dimension_semantics<parallel>], iteration_bounds = array<i64: 2>, scalar_prefetch = 0 : i64, scratch_operands = 1 : i64, tpu.core_type = #tpu.core_type<tc>, window_params = [{transform_indices = @transform_0, window_bounds = array<i64: 1, 22, 512>}, {pipeline_mode = #tpu.pipeline_mode<synchronous>, transform_indices = @transform_1, window_bounds = array<i64: 7, 512, 128>}, {pipeline_mode = #tpu.pipeline_mode<synchronous>, transform_indices = @transform_2, window_bounds = array<i64: 1, 128>}, {pipeline_mode = #tpu.pipeline_mode<synchronous>, transform_indices = @transform_3, window_bounds = array<i64: 7, 128, 512>}, {pipeline_mode = #tpu.pipeline_mode<synchronous>, transform_indices = @transform_4, window_bounds = array<i64: 1, 512>}, {transform_indices = @transform_5, window_bounds = array<i64: 1, 16, 512>}]} {
    %c0 = arith.constant 0 : index
    %c0_0 = arith.constant 0 : index
    %c0_1 = arith.constant 0 : index
    %0 = vector.load %arg1[%c0, %c0_0, %c0_1] : memref<1x22x512xf32, #tpu.memory_space<vmem>>, vector<1x22x512xf32>
    %1 = vector.shape_cast %0 : vector<1x22x512xf32> to vector<22x512xf32>
    %cst = arith.constant 0.000000e+00 : f32
    %2 = vector.broadcast %cst : f32 to vector<16x128xf32>
    %3 = vector.extract_strided_slice %1 {offsets = [0, 0], sizes = [16, 512], strides = [1, 1]} : vector<22x512xf32> to vector<16x512xf32>
    %4 = arith.truncf %3 : vector<16x512xf32> to vector<16x512xbf16>
    %c0_2 = arith.constant 0 : index
    %c0_3 = arith.constant 0 : index
    %c0_4 = arith.constant 0 : index
    %5 = vector.load %arg2[%c0_2, %c0_3, %c0_4] : memref<7x512x128xbf16, #tpu.memory_space<vmem>>, vector<1x512x128xbf16>
    %6 = vector.shape_cast %5 : vector<1x512x128xbf16> to vector<512x128xbf16>
    %cst_5 = arith.constant dense<0.000000e+00> : vector<16x128xf32>
    %7 = tpu.matmul %4, %6, %cst_5 {dimension_numbers = #tpu.dot_dimension_numbers<[1], [0], [0], [1], [0, 0, 1, 1], [], []>} : vector<16x512xbf16>, vector<512x128xbf16>, vector<16x128xf32> -> vector<16x128xf32>
    %8 = arith.addf %2, %7 : vector<16x128xf32>
    %9 = vector.extract_strided_slice %1 {offsets = [1, 0], sizes = [16, 512], strides = [1, 1]} : vector<22x512xf32> to vector<16x512xf32>
    %10 = arith.truncf %9 : vector<16x512xf32> to vector<16x512xbf16>
    %c1 = arith.constant 1 : index
    %c0_6 = arith.constant 0 : index
    %c0_7 = arith.constant 0 : index
    %11 = vector.load %arg2[%c1, %c0_6, %c0_7] : memref<7x512x128xbf16, #tpu.memory_space<vmem>>, vector<1x512x128xbf16>
    %12 = vector.shape_cast %11 : vector<1x512x128xbf16> to vector<512x128xbf16>
    %cst_8 = arith.constant dense<0.000000e+00> : vector<16x128xf32>
    %13 = tpu.matmul %10, %12, %cst_8 {dimension_numbers = #tpu.dot_dimension_numbers<[1], [0], [0], [1], [0, 0, 1, 1], [], []>} : vector<16x512xbf16>, vector<512x128xbf16>, vector<16x128xf32> -> vector<16x128xf32>
    %14 = arith.addf %8, %13 : vector<16x128xf32>
    %15 = vector.extract_strided_slice %1 {offsets = [2, 0], sizes = [16, 512], strides = [1, 1]} : vector<22x512xf32> to vector<16x512xf32>
    %16 = arith.truncf %15 : vector<16x512xf32> to vector<16x512xbf16>
    %c2 = arith.constant 2 : index
    %c0_9 = arith.constant 0 : index
    %c0_10 = arith.constant 0 : index
    %17 = vector.load %arg2[%c2, %c0_9, %c0_10] : memref<7x512x128xbf16, #tpu.memory_space<vmem>>, vector<1x512x128xbf16>
    %18 = vector.shape_cast %17 : vector<1x512x128xbf16> to vector<512x128xbf16>
    %cst_11 = arith.constant dense<0.000000e+00> : vector<16x128xf32>
    %19 = tpu.matmul %16, %18, %cst_11 {dimension_numbers = #tpu.dot_dimension_numbers<[1], [0], [0], [1], [0, 0, 1, 1], [], []>} : vector<16x512xbf16>, vector<512x128xbf16>, vector<16x128xf32> -> vector<16x128xf32>
    %20 = arith.addf %14, %19 : vector<16x128xf32>
    %21 = vector.extract_strided_slice %1 {offsets = [3, 0], sizes = [16, 512], strides = [1, 1]} : vector<22x512xf32> to vector<16x512xf32>
    %22 = arith.truncf %21 : vector<16x512xf32> to vector<16x512xbf16>
    %c3 = arith.constant 3 : index
    %c0_12 = arith.constant 0 : index
    %c0_13 = arith.constant 0 : index
    %23 = vector.load %arg2[%c3, %c0_12, %c0_13] : memref<7x512x128xbf16, #tpu.memory_space<vmem>>, vector<1x512x128xbf16>
    %24 = vector.shape_cast %23 : vector<1x512x128xbf16> to vector<512x128xbf16>
    %cst_14 = arith.constant dense<0.000000e+00> : vector<16x128xf32>
    %25 = tpu.matmul %22, %24, %cst_14 {dimension_numbers = #tpu.dot_dimension_numbers<[1], [0], [0], [1], [0, 0, 1, 1], [], []>} : vector<16x512xbf16>, vector<512x128xbf16>, vector<16x128xf32> -> vector<16x128xf32>
    %26 = arith.addf %20, %25 : vector<16x128xf32>
    %27 = vector.extract_strided_slice %1 {offsets = [4, 0], sizes = [16, 512], strides = [1, 1]} : vector<22x512xf32> to vector<16x512xf32>
    %28 = arith.truncf %27 : vector<16x512xf32> to vector<16x512xbf16>
    %c4 = arith.constant 4 : index
    %c0_15 = arith.constant 0 : index
    %c0_16 = arith.constant 0 : index
    %29 = vector.load %arg2[%c4, %c0_15, %c0_16] : memref<7x512x128xbf16, #tpu.memory_space<vmem>>, vector<1x512x128xbf16>
    %30 = vector.shape_cast %29 : vector<1x512x128xbf16> to vector<512x128xbf16>
    %cst_17 = arith.constant dense<0.000000e+00> : vector<16x128xf32>
    %31 = tpu.matmul %28, %30, %cst_17 {dimension_numbers = #tpu.dot_dimension_numbers<[1], [0], [0], [1], [0, 0, 1, 1], [], []>} : vector<16x512xbf16>, vector<512x128xbf16>, vector<16x128xf32> -> vector<16x128xf32>
    %32 = arith.addf %26, %31 : vector<16x128xf32>
    %33 = vector.extract_strided_slice %1 {offsets = [5, 0], sizes = [16, 512], strides = [1, 1]} : vector<22x512xf32> to vector<16x512xf32>
    %34 = arith.truncf %33 : vector<16x512xf32> to vector<16x512xbf16>
    %c5 = arith.constant 5 : index
    %c0_18 = arith.constant 0 : index
    %c0_19 = arith.constant 0 : index
    %35 = vector.load %arg2[%c5, %c0_18, %c0_19] : memref<7x512x128xbf16, #tpu.memory_space<vmem>>, vector<1x512x128xbf16>
    %36 = vector.shape_cast %35 : vector<1x512x128xbf16> to vector<512x128xbf16>
    %cst_20 = arith.constant dense<0.000000e+00> : vector<16x128xf32>
    %37 = tpu.matmul %34, %36, %cst_20 {dimension_numbers = #tpu.dot_dimension_numbers<[1], [0], [0], [1], [0, 0, 1, 1], [], []>} : vector<16x512xbf16>, vector<512x128xbf16>, vector<16x128xf32> -> vector<16x128xf32>
    %38 = arith.addf %32, %37 : vector<16x128xf32>
    %39 = vector.extract_strided_slice %1 {offsets = [6, 0], sizes = [16, 512], strides = [1, 1]} : vector<22x512xf32> to vector<16x512xf32>
    %40 = arith.truncf %39 : vector<16x512xf32> to vector<16x512xbf16>
    %c6 = arith.constant 6 : index
    %c0_21 = arith.constant 0 : index
    %c0_22 = arith.constant 0 : index
    %41 = vector.load %arg2[%c6, %c0_21, %c0_22] : memref<7x512x128xbf16, #tpu.memory_space<vmem>>, vector<1x512x128xbf16>
    %42 = vector.shape_cast %41 : vector<1x512x128xbf16> to vector<512x128xbf16>
    %cst_23 = arith.constant dense<0.000000e+00> : vector<16x128xf32>
    %43 = tpu.matmul %40, %42, %cst_23 {dimension_numbers = #tpu.dot_dimension_numbers<[1], [0], [0], [1], [0, 0, 1, 1], [], []>} : vector<16x512xbf16>, vector<512x128xbf16>, vector<16x128xf32> -> vector<16x128xf32>
    %44 = arith.addf %38, %43 : vector<16x128xf32>
    %c0_24 = arith.constant 0 : index
    %c0_25 = arith.constant 0 : index
    %45 = vector.load %arg3[%c0_24, %c0_25] : memref<1x128xf32, #tpu.memory_space<vmem>>, vector<1x128xf32>
    %46 = vector.broadcast %45 : vector<1x128xf32> to vector<16x128xf32>
    %47 = arith.addf %44, %46 : vector<16x128xf32>
    %cst_26 = arith.constant 0.000000e+00 : f32
    %48 = vector.broadcast %cst_26 : f32 to vector<16x128xf32>
    %49 = arith.maximumf %47, %48 : vector<16x128xf32>
    %cst_27 = arith.constant 0.000000e+00 : f32
    %50 = vector.broadcast %cst_27 : f32 to vector<22x128xf32>
    %c0_28 = arith.constant 0 : index
    %c0_29 = arith.constant 0 : index
    %51 = vector.load %arg7[%c0_28, %c0_29] : memref<22x128xf32, #tpu.memory_space<vmem>>, vector<22x128xf32>
    tpu.vector_store %arg7[%c0_28, %c0_29], %50 {strides = array<i32>} : memref<22x128xf32, #tpu.memory_space<vmem>>, vector<22x128xf32>,
    %c3_30 = arith.constant 3 : index
    %c0_31 = arith.constant 0 : index
    %52 = vector.load %arg7[%c3_30, %c0_31] : memref<22x128xf32, #tpu.memory_space<vmem>>, vector<16x128xf32>
    tpu.vector_store %arg7[%c3_30, %c0_31], %49 {strides = array<i32>} : memref<22x128xf32, #tpu.memory_space<vmem>>, vector<16x128xf32>,
    %cst_32 = arith.constant 0.000000e+00 : f32
    %53 = vector.broadcast %cst_32 : f32 to vector<16x512xf32>
    %c0_33 = arith.constant 0 : index
    %c0_34 = arith.constant 0 : index
    %54 = vector.load %arg7[%c0_33, %c0_34] : memref<22x128xf32, #tpu.memory_space<vmem>>, vector<16x128xf32>
    %55 = arith.truncf %54 : vector<16x128xf32> to vector<16x128xbf16>
    %c0_35 = arith.constant 0 : index
    %c0_36 = arith.constant 0 : index
    %c0_37 = arith.constant 0 : index
    %56 = vector.load %arg4[%c0_35, %c0_36, %c0_37] : memref<7x128x512xbf16, #tpu.memory_space<vmem>>, vector<1x128x512xbf16>
    %57 = vector.shape_cast %56 : vector<1x128x512xbf16> to vector<128x512xbf16>
    %cst_38 = arith.constant dense<0.000000e+00> : vector<16x512xf32>
    %58 = tpu.matmul %55, %57, %cst_38 {dimension_numbers = #tpu.dot_dimension_numbers<[1], [0], [0], [1], [0, 0, 1, 1], [], []>} : vector<16x128xbf16>, vector<128x512xbf16>, vector<16x512xf32> -> vector<16x512xf32>
    %59 = arith.addf %53, %58 : vector<16x512xf32>
    %c1_39 = arith.constant 1 : index
    %c0_40 = arith.constant 0 : index
    %60 = vector.load %arg7[%c1_39, %c0_40] : memref<22x128xf32, #tpu.memory_space<vmem>>, vector<16x128xf32>
    %61 = arith.truncf %60 : vector<16x128xf32> to vector<16x128xbf16>
    %c1_41 = arith.constant 1 : index
    %c0_42 = arith.constant 0 : index
    %c0_43 = arith.constant 0 : index
    %62 = vector.load %arg4[%c1_41, %c0_42, %c0_43] : memref<7x128x512xbf16, #tpu.memory_space<vmem>>, vector<1x128x512xbf16>
    %63 = vector.shape_cast %62 : vector<1x128x512xbf16> to vector<128x512xbf16>
    %cst_44 = arith.constant dense<0.000000e+00> : vector<16x512xf32>
    %64 = tpu.matmul %61, %63, %cst_44 {dimension_numbers = #tpu.dot_dimension_numbers<[1], [0], [0], [1], [0, 0, 1, 1], [], []>} : vector<16x128xbf16>, vector<128x512xbf16>, vector<16x512xf32> -> vector<16x512xf32>
    %65 = arith.addf %59, %64 : vector<16x512xf32>
    %c2_45 = arith.constant 2 : index
    %c0_46 = arith.constant 0 : index
    %66 = vector.load %arg7[%c2_45, %c0_46] : memref<22x128xf32, #tpu.memory_space<vmem>>, vector<16x128xf32>
    %67 = arith.truncf %66 : vector<16x128xf32> to vector<16x128xbf16>
    %c2_47 = arith.constant 2 : index
    %c0_48 = arith.constant 0 : index
    %c0_49 = arith.constant 0 : index
    %68 = vector.load %arg4[%c2_47, %c0_48, %c0_49] : memref<7x128x512xbf16, #tpu.memory_space<vmem>>, vector<1x128x512xbf16>
    %69 = vector.shape_cast %68 : vector<1x128x512xbf16> to vector<128x512xbf16>
    %cst_50 = arith.constant dense<0.000000e+00> : vector<16x512xf32>
    %70 = tpu.matmul %67, %69, %cst_50 {dimension_numbers = #tpu.dot_dimension_numbers<[1], [0], [0], [1], [0, 0, 1, 1], [], []>} : vector<16x128xbf16>, vector<128x512xbf16>, vector<16x512xf32> -> vector<16x512xf32>
    %71 = arith.addf %65, %70 : vector<16x512xf32>
    %c3_51 = arith.constant 3 : index
    %c0_52 = arith.constant 0 : index
    %72 = vector.load %arg7[%c3_51, %c0_52] : memref<22x128xf32, #tpu.memory_space<vmem>>, vector<16x128xf32>
    %73 = arith.truncf %72 : vector<16x128xf32> to vector<16x128xbf16>
    %c3_53 = arith.constant 3 : index
    %c0_54 = arith.constant 0 : index
    %c0_55 = arith.constant 0 : index
    %74 = vector.load %arg4[%c3_53, %c0_54, %c0_55] : memref<7x128x512xbf16, #tpu.memory_space<vmem>>, vector<1x128x512xbf16>
    %75 = vector.shape_cast %74 : vector<1x128x512xbf16> to vector<128x512xbf16>
    %cst_56 = arith.constant dense<0.000000e+00> : vector<16x512xf32>
    %76 = tpu.matmul %73, %75, %cst_56 {dimension_numbers = #tpu.dot_dimension_numbers<[1], [0], [0], [1], [0, 0, 1, 1], [], []>} : vector<16x128xbf16>, vector<128x512xbf16>, vector<16x512xf32> -> vector<16x512xf32>
    %77 = arith.addf %71, %76 : vector<16x512xf32>
    %c4_57 = arith.constant 4 : index
    %c0_58 = arith.constant 0 : index
    %78 = vector.load %arg7[%c4_57, %c0_58] : memref<22x128xf32, #tpu.memory_space<vmem>>, vector<16x128xf32>
    %79 = arith.truncf %78 : vector<16x128xf32> to vector<16x128xbf16>
    %c4_59 = arith.constant 4 : index
    %c0_60 = arith.constant 0 : index
    %c0_61 = arith.constant 0 : index
    %80 = vector.load %arg4[%c4_59, %c0_60, %c0_61] : memref<7x128x512xbf16, #tpu.memory_space<vmem>>, vector<1x128x512xbf16>
    %81 = vector.shape_cast %80 : vector<1x128x512xbf16> to vector<128x512xbf16>
    %cst_62 = arith.constant dense<0.000000e+00> : vector<16x512xf32>
    %82 = tpu.matmul %79, %81, %cst_62 {dimension_numbers = #tpu.dot_dimension_numbers<[1], [0], [0], [1], [0, 0, 1, 1], [], []>} : vector<16x128xbf16>, vector<128x512xbf16>, vector<16x512xf32> -> vector<16x512xf32>
    %83 = arith.addf %77, %82 : vector<16x512xf32>
    %c5_63 = arith.constant 5 : index
    %c0_64 = arith.constant 0 : index
    %84 = vector.load %arg7[%c5_63, %c0_64] : memref<22x128xf32, #tpu.memory_space<vmem>>, vector<16x128xf32>
    %85 = arith.truncf %84 : vector<16x128xf32> to vector<16x128xbf16>
    %c5_65 = arith.constant 5 : index
    %c0_66 = arith.constant 0 : index
    %c0_67 = arith.constant 0 : index
    %86 = vector.load %arg4[%c5_65, %c0_66, %c0_67] : memref<7x128x512xbf16, #tpu.memory_space<vmem>>, vector<1x128x512xbf16>
    %87 = vector.shape_cast %86 : vector<1x128x512xbf16> to vector<128x512xbf16>
    %cst_68 = arith.constant dense<0.000000e+00> : vector<16x512xf32>
    %88 = tpu.matmul %85, %87, %cst_68 {dimension_numbers = #tpu.dot_dimension_numbers<[1], [0], [0], [1], [0, 0, 1, 1], [], []>} : vector<16x128xbf16>, vector<128x512xbf16>, vector<16x512xf32> -> vector<16x512xf32>
    %89 = arith.addf %83, %88 : vector<16x512xf32>
    %c6_69 = arith.constant 6 : index
    %c0_70 = arith.constant 0 : index
    %90 = vector.load %arg7[%c6_69, %c0_70] : memref<22x128xf32, #tpu.memory_space<vmem>>, vector<16x128xf32>
    %91 = arith.truncf %90 : vector<16x128xf32> to vector<16x128xbf16>
    %c6_71 = arith.constant 6 : index
    %c0_72 = arith.constant 0 : index
    %c0_73 = arith.constant 0 : index
    %92 = vector.load %arg4[%c6_71, %c0_72, %c0_73] : memref<7x128x512xbf16, #tpu.memory_space<vmem>>, vector<1x128x512xbf16>
    %93 = vector.shape_cast %92 : vector<1x128x512xbf16> to vector<128x512xbf16>
    %cst_74 = arith.constant dense<0.000000e+00> : vector<16x512xf32>
    %94 = tpu.matmul %91, %93, %cst_74 {dimension_numbers = #tpu.dot_dimension_numbers<[1], [0], [0], [1], [0, 0, 1, 1], [], []>} : vector<16x128xbf16>, vector<128x512xbf16>, vector<16x512xf32> -> vector<16x512xf32>
    %95 = arith.addf %89, %94 : vector<16x512xf32>
    %c0_75 = arith.constant 0 : index
    %c0_76 = arith.constant 0 : index
    %96 = vector.load %arg5[%c0_75, %c0_76] : memref<1x512xf32, #tpu.memory_space<vmem>>, vector<1x512xf32>
    %97 = vector.broadcast %96 : vector<1x512xf32> to vector<16x512xf32>
    %98 = arith.addf %95, %97 : vector<16x512xf32>
    %99 = arith.negf %98 : vector<16x512xf32>
    %100 = math.exp %99 : vector<16x512xf32>
    %cst_77 = arith.constant 1.000000e+00 : f32
    %101 = vector.broadcast %cst_77 : f32 to vector<16x512xf32>
    %102 = arith.addf %101, %100 : vector<16x512xf32>
    %103 = arith.divf %101, %102 : vector<16x512xf32>
    %104 = vector.extract_strided_slice %1 {offsets = [3, 0], sizes = [16, 512], strides = [1, 1]} : vector<22x512xf32> to vector<16x512xf32>
    %105 = arith.mulf %104, %103 : vector<16x512xf32>
    %c0_78 = arith.constant 0 : index
    %c0_79 = arith.constant 0 : index
    %c0_80 = arith.constant 0 : index
    %106 = vector.load %arg6[%c0_78, %c0_79, %c0_80] : memref<1x16x512xf32, #tpu.memory_space<vmem>>, vector<1x16x512xf32>
    %107 = vector.shape_cast %106 : vector<1x16x512xf32> to vector<16x512xf32>
    %108 = vector.shape_cast %105 : vector<16x512xf32> to vector<1x16x512xf32>
    tpu.vector_store %arg6[%c0_78, %c0_79, %c0_80], %108 {strides = array<i32>} : memref<1x16x512xf32, #tpu.memory_space<vmem>>, vector<1x16x512xf32>,
    return
  }
  func.func @transform_0(%arg0: i32) -> (i32, i32, i32) {
    %c0_i32 = arith.constant 0 : i32
    %c0_i32_0 = arith.constant 0 : i32
    %c0_i32_1 = arith.constant 0 : i32
    return %arg0, %c0_i32, %c0_i32_0 : i32, i32, i32
  }
  func.func @transform_1(%arg0: i32) -> (i32, i32, i32) {
    %c0_i32 = arith.constant 0 : i32
    %c0_i32_0 = arith.constant 0 : i32
    %c0_i32_1 = arith.constant 0 : i32
    %c0_i32_2 = arith.constant 0 : i32
    return %c0_i32, %c0_i32_0, %c0_i32_1 : i32, i32, i32
  }
  func.func @transform_2(%arg0: i32) -> (i32, i32) {
    %c0_i32 = arith.constant 0 : i32
    %c0_i32_0 = arith.constant 0 : i32
    %c0_i32_1 = arith.constant 0 : i32
    return %c0_i32, %c0_i32_0 : i32, i32
  }
  func.func @transform_3(%arg0: i32) -> (i32, i32, i32) {
    %c0_i32 = arith.constant 0 : i32
    %c0_i32_0 = arith.constant 0 : i32
    %c0_i32_1 = arith.constant 0 : i32
    %c0_i32_2 = arith.constant 0 : i32
    return %c0_i32, %c0_i32_0, %c0_i32_1 : i32, i32, i32
  }
  func.func @transform_4(%arg0: i32) -> (i32, i32) {
    %c0_i32 = arith.constant 0 : i32
    %c0_i32_0 = arith.constant 0 : i32
    %c0_i32_1 = arith.constant 0 : i32
    return %c0_i32, %c0_i32_0 : i32, i32
  }
  func.func @transform_5(%arg0: i32) -> (i32, i32, i32) {
    %c0_i32 = arith.constant 0 : i32
    %c0_i32_0 = arith.constant 0 : i32
    %c0_i32_1 = arith.constant 0 : i32
    return %arg0, %c0_i32, %c0_i32_0 : i32, i32, i32
  }
}

</mosaic_0001>

<bundles_post_ra>
// kernel: tpu_custom_call.1
= control target key start
LH: loop header
LB: loop body
LE: loop exit
PB: predicated region body
PF: predicated region fallthrough
CT: control target
= control target key end

     0   :  { %10 = vsyncpa [#allocation4], 0  ;;  %s7176_s0 = inlined_call_operand.vmem [shape: f32[2,22,512], index: 0, kind: input, shape index: {}]   ;;  %s7177_s1 = inlined_call_operand.hbm [shape: bf16[7,512,128], index: 1, kind: input, shape index: {}]   ;;  %s7178_s2 = inlined_call_operand.vmem [shape: f32[1,128], index: 2, kind: input, shape index: {}]   ;;  %s7179_s3 = inlined_call_operand.hbm [shape: bf16[7,128,512], index: 3, kind: input, shape index: {}]   ;;  %s7180_s4 = inlined_call_operand.vmem [shape: f32[1,512], index: 4, kind: input, shape index: {}]   ;;  %s7181_s5 = inlined_call_operand.hbm [shape: f32[2,16,512], index: 5, kind: output, shape index: {}]  }
   0x1   :  { %11 = vsyncpa [#allocation7], 0 }
   0x2   :  { %12 = vsyncpa [#allocation5], 0 }
   0x3   :  { %14 = vsyncpa [#allocation5 + $0x1], 0  ;;  %s6758_s18 = smov 0   ;;  %s6760_s19 = smov 0  }
   0x4   :  { %s6762_s20 = smov 0   ;;  %s6764_s21 = smov 0  }
   0x5 LB: > { %s6779_s22 = sadd.s32 4294967295, %s6715_s21   ;;  %s5141_s23 = sadd.s32 4294967294, %s6715_s21   ;;  %s6715_s21 = sphi %s6764_s21, %s7195_s21   ;;  %s6711_s20 = sphi %s6762_s20, %s7194_s20   ;;  %s6707_s19 = sphi %s6760_s19, %s7193_s19   ;;  %s6703_s18 = sphi %s6758_s18, %s7192_s18  }
   0x6   : > { %s6783_s24 = sadd.s32 1, %s6715_s21   ;;  %s137_s25 = sadd.s32 1, %s6711_s20 }
   0x7   : > { %s134_s26 = ssub.s32 %s6715_s21, %s6783_s24  ;;  %p147_p0 = scmp.ne.s32.totalorder %s6711_s20, %s6707_s19 }
   0x8   : > { %p135_p1 = scmp.eq.s32.totalorder %s134_s26, 0  ;;  %p148_p2 = scmp.eq.s32.totalorder %s6779_s22, 1 }
   0x9   : > { %p153_p3 = scmp.ne.s32.totalorder %s6707_s19, %s6703_s18  ;;  %p154_p4 = scmp.eq.s32.totalorder %s5141_s23, 1 }
   0xa   : > { %s6794_s27 = scalar_select %p135_p1, %s6711_s20, %s137_s25  }
   0xb   : > { %p6796_p5 = por %p148_p2, %p147_p0  ;;  %p6800_p6 = por %p154_p4, %p153_p3 }
   0xc   : > { %p5142_p7 = scmp.ge.s32.totalorder %s6715_s21, 1  ;;  %p161_p8 = scmp.lt.s32.totalorder %s6715_s21, 3 }
   0xd   : > { %s7184_s29 = scalar_select %p6800_p6, 1, 0 }
   0xe   : > { %p7182_p9 = scmp.eq.s32.totalorder %s6779_s22, 0  ;;  %p6807_p10 = pnand %p5142_p7, %p161_p8 }
   0xf   : > { %s6717_s6 = smov [#allocation3]   ;;  %s6718_s9 = smov [#allocation6]  }
  0x10   : > { %s173_s7 = sshll.u32 %s6717_s6, 4  ;;  %p5933_p11 = pneg %p6807_p10  ;;  %s174_s7 = int_to_ptr.vmem [resolvable:$true] %s173_s7 }
  0x11   : > { %s189_s10 = sshll.u32 %s6718_s9, 4  ;;  %s6606_s11 = scalar_lea.vmem %s174_s7, 28672  ;;  %s190_s10 = int_to_ptr.vmem [resolvable:$true] %s189_s10 }
  0x12   : > { %p6815_p12 = pnand %p7182_p9, %p5933_p11  ;;  %p6607_p0 = scmp.ne.s32.totalorder %s174_s7, %s6606_s11 }
  0x13   : > { %p6614_p3 = scmp.lt.s32.totalorder %s174_s7, %s174_s7  ;;  %p6615_p4 = scmp.lt.s32.totalorder %s6606_s11, %s6606_s11 }
  0x14   : > { %p6597_p13 = pneg %p6815_p12 }
  0x15   : > { %p6616_p7 = por %p6615_p4, %p6614_p3 }
  0x16   : > { %p6609_p1 = pnand %p6607_p0, %p6597_p13 }
  0x18   : > { %p6610_p2 = pneg %p6609_p1 }
  0x1a   : > { %p6617_p8 = pnand %p6616_p7, %p6610_p2 }
  0x1c   : > { %6620 = shalt.err (!%p6617_p8)
}
  0x1d   : > { %s6719_s12 = smov 64   ;;  %s6720_s13 = smov 4  }
  0x1e   : > { %5936 = dma.hbm_to_vmem [thread:$0]  (!%p6815_p12), %s7177_s1, 28672, %s174_s7, [#allocation4], %s6719_s12, %s6719_s12, %s6720_s13  }
  0x1f   : > { %s6632_s16 = scalar_lea.vmem %s190_s10, 28672  ;;  %p6640_p9 = scmp.lt.s32.totalorder %s190_s10, %s190_s10 }
  0x20   : > { %p6633_p11 = scmp.ne.s32.totalorder %s190_s10, %s6632_s16  ;;  %p6641_p6 = scmp.lt.s32.totalorder %s6632_s16, %s6632_s16 }
  0x22   : > { %p6635_p0 = pnand %p6633_p11, %p6597_p13  ;;  %p6642_p3 = por %p6641_p6, %p6640_p9 }
  0x24   : > { %p6636_p1 = pneg %p6635_p0 }
  0x26   : > { %p6643_p2 = pnand %p6642_p3, %p6636_p1 }
  0x28   : > { %6646 = shalt.err (!%p6643_p2)
}
  0x29   : > { %s6721_s17 = smov 256   ;;  %s6722_s23 = smov 16  }
  0x2a   : > { %5939 = dma.hbm_to_vmem [thread:$0]  (!%p6815_p12), %s7179_s3, 28672, %s190_s10, [#allocation7], %s6721_s17, %s6721_s17, %s6722_s23  }
  0x2b   : > { %216 = sbr.rel (%p6807_p10) target bundleno = 950 (0x3b6), region = 40  ;;  %p7187_p4 = scmp.eq.s32.totalorder (!%p6807_p10), %s6779_s22, 0 }
  0x30   : > { %6690 = dma.done.wait (%p7187_p4), [#allocation4], 28672   ;;  %p7188_p13 = pmov %p7187_p4 }
  0x31   : > { %p7189_p6 = pmov %p7187_p4 }
  0x32   : > { %6692 = vsyncadd (%p7188_p13), [#allocation4], 4294938624 }
  0x33   : > { %6694 = dma.done.wait (%p7189_p6), [#allocation7], 28672   ;;  %p7190_p9 = pmov %p7187_p4 }
  0x34   : > { %v5991_v0 = vld [vmem:[#allocation3 + $0x178] sm:$0xff]   ;;  %v5995_v4 = vld [vmem:[#allocation3 + $0x170] sm:$0xff]   ;;  %v5999_v8 = vld [vmem:[#allocation3 + $0x168] sm:$0xff]   ;;  %p248_p10 = scmp.lt.s32.totalorder %s6779_s22, 1  ;;  %vm403_vm0 = vsmask.f32 7424 }
  0x35   : > { %6696 = vsyncadd (%p7190_p9), [#allocation7], 4294938624  ;;  %v5992_v1 = vld [vmem:[#allocation3 + $0x1f8] sm:$0xff]   ;;  %5614 = vmatprep.subr.bf16.mxu0 %v5991_v0  ;;  %v5996_v5 = vld [vmem:[#allocation3 + $0x1f0] sm:$0xff]   ;;  %vm1435_vm1 = vsmask.f32 6400 }
  0x36   : > { %v5993_v2 = vld [vmem:[#allocation3 + $0x138] sm:$0xff]   ;;  %5636 = vmatprep.subr.bf16.mxu1 %v5992_v1  ;;  %v5997_v6 = vld [vmem:[#allocation3 + $0x130] sm:$0xff]   ;;  %v6000_v9 = vld [vmem:[#allocation3 + $0x1e8] sm:$0xff]   ;;  %s249_s30 = scalar_select %p248_p10, %s6779_s22, 1  ;;  %vm1077_vm2 = vcmask 1046528   ;;  %vm1817_vm3 = vcmask 1045504  }
  0x37   : > { %v5994_v3 = vld [vmem:[#allocation3 + $0x1b8] sm:$0xff]   ;;  %5615 = vmatpush3.bf16.msra.mxu0 %v5993_v2  ;;  %v5998_v7 = vld [vmem:[#allocation3 + $0x1b0] sm:$0xff]   ;;  %v6001_v10 = vld [vmem:[#allocation3 + $0x128] sm:$0xff]   ;;  %vm2549_vm4 = vcmask 1044480   ;;  %vm2175_vm5 = vsmask.f32 5376 }
  0x38   : > { %5637 = vmatpush3.bf16.msra.mxu1 %v5994_v3  ;;  %5616 = vmatprep.subr.bf16.mxu0 %v5995_v4  ;;  %v6002_v11 = vld [vmem:[#allocation3 + $0x1a8] sm:$0xff]   ;;  %v6003_v12 = vld [vmem:[#allocation3 + $0x160] sm:$0xff]   ;;  %v6007_v16 = vld [vmem:[#allocation3 + $0x158] sm:$0xff]   ;;  %s5922_s6 = smul.u32 96, %s249_s30  ;;  %s245_s14 = sand.u32 1, %s6707_s19   ;;  %vm4957_vm6 = vcmask 1042432  }
  0x39   : > { %5638 = vmatprep.subr.bf16.mxu1 %v5996_v5  ;;  %v6004_v13 = vld [vmem:[#allocation3 + $0x1e0] sm:$0xff]   ;;  %v6008_v17 = vld [vmem:[#allocation3 + $0x1d8] sm:$0xff]   ;;  %v6011_v20 = vld [vmem:[#allocation3 + $0x150] sm:$0xff]   ;;  %s7102_s15 = sshll.u32 %s245_s14, 6  ;;  %s5613_s16 = sshll.u32 %s6779_s22, 10 }
  0x3a   : > { %v6005_v14 = vld [vmem:[#allocation3 + $0x120] sm:$0xff]   ;;  %v6009_v18 = vld [vmem:[#allocation3 + $0x118] sm:$0xff]   ;;  %v6012_v21 = vld [vmem:[#allocation3 + $0x1d0] sm:$0xff]   ;;  %s6852_s9 = scalar_lea.vmem %s7176_s0, %s5922_s6  ;;  %s247_s17 = scalar_lea.vmem [#allocation8], %s7102_s15 }
  0x3b   : > { %5617 = vmatpush3.bf16.msra.mxu0 %v5997_v6  ;;  %v6006_v15 = vld [vmem:[#allocation3 + $0x1a0] sm:$0xff]   ;;  %v6010_v19 = vld [vmem:[#allocation3 + $0x198] sm:$0xff]   ;;  %v6013_v22 = vld [vmem:[#allocation3 + $0x110] sm:$0xff]   ;;  %s5057_s23 = sshll.u32 %s247_s17, 4  ;;  %s7126_s26 = scalar_lea.hbm %s7181_s5, %s5613_s16  ;;  %s7128_s23 = int_to_ptr.vmem [resolvable:$true] %s5057_s23 }
  0x3c   : > { %5639 = vmatpush3.bf16.msra.mxu1 %v5998_v7  ;;  %5618 = vmatprep.subr.bf16.mxu0 %v5999_v8  ;;  %v6014_v23 = vld [vmem:[#allocation3 + $0x190] sm:$0xff]   ;;  %v6015_v24 = vld [vmem:[#allocation3 + $0x148] sm:$0xff]   ;;  %v6019_v28 = vld [vmem:[#allocation3 + $0x140] sm:$0xff]   ;;  %s7136_s30 = scalar_lea.sflag [#allocation5], %s245_s14  ;;  %s6647_s6 = scalar_lea.vmem %s7128_s23, 1024 }
  0x3d   : > { %5640 = vmatprep.subr.bf16.mxu1 %v6000_v9  ;;  %v6016_v25 = vld [vmem:[#allocation3 + $0x1c8] sm:$0xff]   ;;  %v6020_v29 = vld [vmem:[#allocation3 + $0x1c0] sm:$0xff]   ;;  %v255_v32 = vld [vmem:[%s6852_s9 + $0x8] sm:$0xff]  ;;  %p6648_p12 = scmp.ne.s32.totalorder %s7128_s23, %s6647_s6  ;;  %s6725_s7 = smov [#allocation8]  }
  0x3e   : > { %v6017_v26 = vld [vmem:[#allocation3 + $0x108] sm:$0xff]   ;;  %v6021_v30 = vld [vmem:[#allocation3 + $0x100] sm:$0xff]   ;;  %v259_v33 = vld [vmem:[%s6852_s9 + $0x28] sm:$0xff]  ;;  %s6651_s8 = sshll.u32 %s6725_s7, 4  ;;  %s6652_s8 = int_to_ptr.vmem [resolvable:$false] %s6651_s8 }
  0x3f   : > { %5619 = vmatpush3.bf16.msra.mxu0 %v6001_v10  ;;  %v6018_v27 = vld [vmem:[#allocation3 + $0x188] sm:$0xff]   ;;  %v6022_v31 = vld [vmem:[#allocation3 + $0x180] sm:$0xff]   ;;  %v263_v34 = vld [vmem:[%s6852_s9 + $0x48] sm:$0x3f]  ;;  %v6857_v35 = vpack.c.bf16 %v259_v33, %v255_v32  ;;  %p6649_p7 = pnand %p6648_p12, %p6796_p5  ;;  %p6654_p11 = scmp.lt.s32.totalorder %s7128_s23, %s6652_s8 }
  0x40   : > { %5641 = vmatpush3.bf16.msra.mxu1 %v6002_v11  ;;  %5620 = vmatprep.subr.bf16.mxu0 %v6003_v12  ;;  %v6859_v36 = vpack.c.bf16 %v263_v34, %v263_v34  ;;  %v257_v37 = vld [vmem:[%s6852_s9 + $0x18] sm:$0xff]  ;;  %v254_v42 = vld [vmem:[%s6852_s9] sm:$0xff]  ;;  %v256_v49 = vld [vmem:[%s6852_s9 + $0x10] sm:$0xff] }
  0x41   : > { %5642 = vmatprep.subr.bf16.mxu1 %v6004_v13  ;;  %v261_v38 = vld [vmem:[%s6852_s9 + $0x38] sm:$0xff]  ;;  %v258_v43 = vld [vmem:[%s6852_s9 + $0x20] sm:$0xff]  ;;  %v6872_v45 = vshrl.u32 %v6857_v35, 16  ;;  %v6875_v46 = vshll.u32 %v6857_v35, 16  ;;  %v260_v50 = vld [vmem:[%s6852_s9 + $0x30] sm:$0xff]  ;;  %p6650_p8 = pneg %p6649_p7 }
  0x42   : > { %v265_v39 = vld [vmem:[%s6852_s9 + $0x58] sm:$0x3f]  ;;  %v6864_v40 = vpack.c.bf16 %v261_v38, %v257_v37  ;;  %v262_v44 = vld [vmem:[%s6852_s9 + $0x40] sm:$0x3f]  ;;  %v6878_v47 = vshll.u32 %v6859_v36, 16  ;;  %v6880_v48 = vpack.c.bf16 %v258_v43, %v254_v42  ;;  %v6023_v51 = vld [vmem:[#allocation3 + $0x78] sm:$0xff]   ;;  %v6909_v1 = vpack.c.bf16 %v260_v50, %v256_v49 }
  0x43   : > { %5621 = vmatpush3.bf16.msra.mxu0 %v6005_v14  ;;  %v6866_v41 = vpack.c.bf16 %v265_v39, %v265_v39  ;;  %v6893_v55 = vpack.c.bf16 %v262_v44, %v262_v44  ;;  %v264_v56 = vld [vmem:[%s6852_s9 + $0x50] sm:$0x3f]  ;;  %v421_v58 = vrot.slane %v6875_v46, 1  ;;  %v6037_v33 = vld [vmem:[#allocation3 + $0x20] sm:$0xff]   ;;  %v1445_v38 = vrot.slane %v6872_v45, 1 }
  0x44   : > { %5643 = vmatpush3.bf16.msra.mxu1 %v6006_v15  ;;  %5622 = vmatprep.subr.bf16.mxu0 %v6007_v16  ;;  %v6885_v52 = vshrl.u32 %v6864_v40, 16  ;;  %v6888_v53 = vshll.u32 %v6864_v40, 16  ;;  %v6024_v57 = vld [vmem:[#allocation3 + $0xf8] sm:$0xff]   ;;  %v426_v59 = vrot.slane %v6878_v47, 1  ;;  %v6899_v60 = vshrl.u32 %v6880_v48, 16  ;;  %v6027_v16 = vld [vmem:[#allocation3 + $0x70] sm:$0xff]  }
  0x45   : > { %5644 = vmatprep.subr.bf16.mxu1 %v6008_v17  ;;  %v6891_v54 = vshll.u32 %v6866_v41, 16  ;;  %v6902_v61 = vshll.u32 %v6880_v48, 16  ;;  %v6907_v0 = vshll.u32 %v6893_v55, 16  ;;  %v422_v2 = vor.u32 %v421_v58, %v6872_v45  ;;  %v6025_v12 = vld [vmem:[#allocation3 + $0x38] sm:$0xff]   ;;  %v6038_v39 = vld [vmem:[#allocation3 + $0xa0] sm:$0xff]  }
  0x46   : > { %v445_v62 = vrot.slane %v6888_v53, 1  ;;  %v6913_v4 = vpack.c.bf16 %v264_v56, %v264_v56  ;;  %v6918_v7 = vshrl.u32 %v6909_v1, 16  ;;  %v6921_v8 = vshll.u32 %v6909_v1, 16  ;;  %v6026_v15 = vld [vmem:[#allocation3 + $0xb8] sm:$0xff]   ;;  %v6043_v56 = vld [vmem:[#allocation3 + $0x50] sm:$0xff]  }
  0x47   : > { %5623 = vmatpush3.bf16.msra.mxu0 %v6009_v18  ;;  %v450_v63 = vrot.slane %v6891_v54, 1  ;;  %v409_v3 = vrot.slane %v6902_v61, 1  ;;  %v414_v6 = vrot.slane %v6907_v0, 1  ;;  %v427_v9 = vsel %vm403_vm0, %v422_v2, %v426_v59  ;;  %v6039_v37 = vld [vmem:[#allocation3 + $0x58] sm:$0xff]  }
  0x48   : > { %5645 = vmatpush3.bf16.msra.mxu1 %v6010_v19  ;;  %5624 = vmatprep.subr.bf16.mxu0 %v6011_v20  ;;  %v446_v5 = vor.u32 %v445_v62, %v6885_v52  ;;  %v6926_v11 = vshll.u32 %v6913_v4, 16  ;;  %v433_v14 = vrot.slane %v6921_v8, 1  ;;  %v6028_v19 = vld [vmem:[#allocation3 + $0xf0] sm:$0xff]   ;;  %v1087_v32 = vrot.slane %v6864_v40, 1  ;;  %v6040_v43 = vld [vmem:[#allocation3 + $0xd8] sm:$0xff]  }
  0x49   : > { %5646 = vmatprep.subr.bf16.mxu1 %v6012_v21  ;;  %v410_v10 = vor.u32 %v409_v3, %v6899_v60  ;;  %680 = vmatprep.mubr.bf16.mxu0 %v427_v9  ;;  %v6029_v20 = vld [vmem:[#allocation3 + $0x30] sm:$0xff]   ;;  %v1088_v34 = vrot.slane %v6866_v41, 1  ;;  %v1446_v42 = vrot.slane %v6875_v46, 2  ;;  %v1448_v44 = vshrl.u32 %v6859_v36, 16  ;;  %v6041_v49 = vld [vmem:[#allocation3 + $0x18] sm:$0xff]  }
  0x4a   : > { %v451_v13 = vsel %vm403_vm0, %v446_v5, %v450_v63  ;;  %v438_v18 = vrot.slane %v6926_v11, 1  ;;  %v434_v21 = vor.u32 %v433_v14, %v6918_v7  ;;  %v6042_v58 = vld [vmem:[#allocation3 + $0x98] sm:$0xff]   ;;  %v1463_v59 = vrot.slane %v6885_v52, 1  ;;  %v6044_v62 = vld [vmem:[#allocation3 + $0xd0] sm:$0xff]  }
  0x4b   : > { %5625 = vmatpush3.bf16.msra.mxu0 %v6013_v22  ;;  %721 = vmatprep.mubr.bf16.mxu1 %v451_v13  ;;  %v415_v17 = vsel %vm403_vm0, %v410_v10, %v414_v6  ;;  %v1447_v50 = vor.u32 %v1446_v42, %v1445_v38  ;;  %v1464_v2 = vrot.slane %v6888_v53, 2  ;;  %v6045_v3 = vld [vmem:[#allocation3 + $0x10] sm:$0xff]   ;;  %v1466_v5 = vshrl.u32 %v6866_v41, 16  ;;  %v6047_v6 = vld [vmem:[#allocation3 + $0x48] sm:$0xff]  }
  0x4c   : > { %5647 = vmatpush3.bf16.msra.mxu1 %v6014_v23  ;;  %5626 = vmatprep.subr.bf16.mxu0 %v6015_v24  ;;  %v439_v22 = vsel %vm403_vm0, %v434_v21, %v438_v18  ;;  %v6031_v23 = vld [vmem:[#allocation3 + $0x68] sm:$0xff]   ;;  %v6030_v24 = vld [vmem:[#allocation3 + $0xb0] sm:$0xff]   ;;  %v1439_v21 = vshrl.u32 %v6893_v55, 16  ;;  %v1455_v38 = vrot.slane %v6921_v8, 2  ;;  %v1457_v42 = vshrl.u32 %v6913_v4, 16 }
  0x4d   : > { %5648 = vmatprep.subr.bf16.mxu1 %v6016_v25  ;;  %v6032_v25 = vld [vmem:[#allocation3 + $0xe8] sm:$0xff]   ;;  %v1465_v10 = vor.u32 %v1464_v2, %v1463_v59  ;;  %v6046_v13 = vld [vmem:[#allocation3 + $0x90] sm:$0xff]   ;;  %v1468_v14 = vrot.slane %v1466_v5, 1  ;;  %v6058_v59 = vld [vmem:[#allocation3 + $0x2b8] sm:$0xff]  }
  0x4e   : > { %v6060_v2 = vld [vmem:[#allocation3 + $0x2f0] sm:$0xff]  }
  0x4f   : > { %5627 = vmatpush3.bf16.msra.mxu0 %v6017_v26  ;;  %v6033_v26 = vld [vmem:[#allocation3 + $0x28] sm:$0xff]  }
  0x50   : > { %5649 = vmatpush3.bf16.msra.mxu1 %v6018_v27  ;;  %5628 = vmatprep.subr.bf16.mxu0 %v6019_v28  ;;  %v6035_v27 = vld [vmem:[#allocation3 + $0x60] sm:$0xff]   ;;  %v1081_v28 = vrot.slane %v6857_v35, 1 }
  0x51   : > { %5650 = vmatprep.subr.bf16.mxu1 %v6020_v29  ;;  %v6034_v29 = vld [vmem:[#allocation3 + $0xa8] sm:$0xff]  }
  0x53   : > { %5629 = vmatpush3.bf16.msra.mxu0 %v6021_v30  ;;  %v1082_v30 = vrot.slane %v6859_v36, 1 }
  0x54   : > { %5651 = vmatpush3.bf16.msra.mxu1 %v6022_v31  ;;  %5658 = vmatprep.subr.bf16.mxu0 %v6023_v51  ;;  %v6036_v31 = vld [vmem:[#allocation3 + $0xe0] sm:$0xff]   ;;  %v1451_v51 = vrot.slane %v6878_v47, 2 }
  0x55   : > { %5680 = vmatprep.subr.bf16.mxu1 %v6024_v57  ;;  %v1450_v57 = vrot.slane %v1448_v44, 1 }
  0x56   : > { %681 = vmatmul.mubr.bf16.vlgmr.msra.gmra.mxu0 %v415_v17  ;;  %v6049_v17 = vld [vmem:[#allocation3 + $0x8] sm:$0xff]  }
  0x57   : > { %5659 = vmatpush3.bf16.msra.mxu0 %v6025_v12  ;;  %954 = vmatprep.mubr.bf16.mxu0 %v6857_v35  ;;  %v1452_v63 = vor.u32 %v1451_v51, %v1450_v57  ;;  %v1469_v12 = vrot.slane %v6891_v54, 2  ;;  %v1460_v51 = vrot.slane %v6926_v11, 2  ;;  %v1459_v57 = vrot.slane %v1457_v42, 1 }
  0x58   : > { %5660 = vmatprep.subr.bf16.mxu0 %v6027_v16  ;;  %722 = vmatmul.mubr.bf16.vlgmr.msra.gmra.mxu1 %v439_v22  ;;  %v1436_v16 = vrot.slane %v6899_v60, 1  ;;  %v6050_v22 = vld [vmem:[#allocation3 + $0x88] sm:$0xff]  }
  0x59   : > { %5681 = vmatpush3.bf16.msra.mxu1 %v6026_v15  ;;  %995 = vmatprep.mubr.bf16.mxu1 %v6864_v40  ;;  %v6950_v9 = vsel %vm1435_vm1, %v1447_v50, %v1452_v63  ;;  %v6048_v15 = vld [vmem:[#allocation3 + $0xc8] sm:$0xff]   ;;  %v1470_v18 = vor.u32 %v1469_v12, %v1468_v14  ;;  %v1461_v63 = vor.u32 %v1460_v51, %v1459_v57  ;;  %v6067_v14 = vld [vmem:[#allocation3 + $0x260] sm:$0xff]   ;;  %v6078_v51 = vld [vmem:[#allocation3 + $0x290] sm:$0xff]  }
  0x5a   : > { %5682 = vmatprep.subr.bf16.mxu1 %v6028_v19  ;;  %v1437_v19 = vrot.slane %v6902_v61, 2  ;;  %v6063_v12 = vld [vmem:[#allocation3 + $0x268] sm:$0xff]  }
  0x5b   : > { %5661 = vmatpush3.bf16.msra.mxu0 %v6029_v20  ;;  %v6051_v20 = vld [vmem:[#allocation3 + $0x40] sm:$0xff]  }
  0x5c   : > { %5662 = vmatprep.subr.bf16.mxu0 %v6031_v23  ;;  %v6959_v23 = vsel %vm1435_vm1, %v1465_v10, %v1470_v18  ;;  %v2186_v18 = vrot.slane %v1448_v44, 2  ;;  %v2200_v44 = vrot.slane %v1466_v5, 2  ;;  %v2179_v5 = vrot.slane %v1439_v21, 2 }
  0x5d   : > { %5683 = vmatpush3.bf16.msra.mxu1 %v6030_v24  ;;  %v1438_v24 = vor.u32 %v1437_v19, %v1436_v16  ;;  %v2184_v16 = vrot.slane %v6875_v46, 3  ;;  %v6071_v19 = vld [vmem:[#allocation3 + $0x258] sm:$0xff]   ;;  %v2198_v46 = vrot.slane %v6888_v53, 3  ;;  %v2177_v53 = vrot.slane %v6902_v61, 3 }
  0x5e   : > { %5684 = vmatprep.subr.bf16.mxu1 %v6032_v25  ;;  %v1442_v25 = vrot.slane %v6907_v0, 2  ;;  %v2191_v61 = vrot.slane %v6921_v8, 3  ;;  %v6085_v8 = vld [vmem:[#allocation3 + $0x200] sm:$0xff]  }
  0x5f   : > { %5663 = vmatpush3.bf16.msra.mxu0 %v6033_v26  ;;  %v6052_v26 = vld [vmem:[#allocation3 + $0xc0] sm:$0xff]  }
  0x60   : > { %5664 = vmatprep.subr.bf16.mxu0 %v6035_v27  ;;  %v1441_v27 = vrot.slane %v1439_v21, 1  ;;  %v2193_v21 = vrot.slane %v1457_v42, 2  ;;  %v6087_v42 = vld [vmem:[#allocation3 + $0x378] sm:$0xff]  }
  0x61   : > { %5685 = vmatpush3.bf16.msra.mxu1 %v6034_v29  ;;  %v6053_v29 = vld [vmem:[#allocation3] sm:$0xff]  }
  0x62   : > { %5686 = vmatprep.subr.bf16.mxu1 %v6036_v31  ;;  %v1454_v31 = vrot.slane %v6918_v7, 1 }
  0x63   : > { %5665 = vmatpush3.bf16.msra.mxu0 %v6037_v33  ;;  %v6055_v33 = vld [vmem:[#allocation3 + $0x278] sm:$0xff]  }
  0x64   : > { %5666 = vmatprep.subr.bf16.mxu0 %v6039_v37  ;;  %v1443_v37 = vor.u32 %v1442_v25, %v1441_v27  ;;  %v1456_v50 = vor.u32 %v1455_v38, %v1454_v31  ;;  %v2197_v25 = vrot.slane %v6885_v52, 2  ;;  %v6073_v27 = vld [vmem:[#allocation3 + $0x218] sm:$0xff]   ;;  %v2176_v52 = vrot.slane %v6899_v60, 2 }
  0x65   : > { %5687 = vmatpush3.bf16.msra.mxu1 %v6038_v39  ;;  %v6054_v39 = vld [vmem:[#allocation3 + $0x80] sm:$0xff]   ;;  %v2190_v60 = vrot.slane %v6918_v7, 2 }
  0x66   : > { %5688 = vmatprep.subr.bf16.mxu1 %v6040_v43  ;;  %v6056_v43 = vld [vmem:[#allocation3 + $0x2f8] sm:$0xff]   ;;  %v6985_v10 = vsel %vm1435_vm1, %v1456_v50, %v1461_v63  ;;  %v7001_v31 = vor.u32 %v2198_v46, %v2197_v25  ;;  %v7010_v50 = vor.u32 %v2177_v53, %v2176_v52  ;;  %v6082_v63 = vld [vmem:[#allocation3 + $0x288] sm:$0xff]   ;;  %v6084_v7 = vld [vmem:[#allocation3 + $0x2c0] sm:$0xff]  }
  0x67   : > { %5667 = vmatpush3.bf16.msra.mxu0 %v6041_v49  ;;  %v6968_v49 = vsel %vm1435_vm1, %v1438_v24, %v1443_v37  ;;  %v6070_v24 = vld [vmem:[#allocation3 + $0x2a0] sm:$0xff]   ;;  %v6076_v37 = vld [vmem:[#allocation3 + $0x2d0] sm:$0xff]   ;;  %v6111_v53 = vld [vmem:[#allocation3 + $0x348] sm:$0xff]  }
  0x68   : > { %5668 = vmatprep.subr.bf16.mxu0 %v6043_v56  ;;  %v6057_v56 = vld [vmem:[#allocation3 + $0x238] sm:$0xff]   ;;  %v6099_v25 = vld [vmem:[#allocation3 + $0x360] sm:$0xff]   ;;  %v6108_v52 = vld [vmem:[#allocation3 + $0x3d0] sm:$0xff]  }
  0x69   : > { %5689 = vmatpush3.bf16.msra.mxu1 %v6042_v58  ;;  %v6059_v58 = vld [vmem:[#allocation3 + $0x270] sm:$0xff]   ;;  %v6100_v46 = vld [vmem:[#allocation3 + $0x3e0] sm:$0xff]  }
  0x6a   : > { %5690 = vmatprep.subr.bf16.mxu1 %v6044_v62  ;;  %v1083_v62 = vsel %vm1077_vm2, %v1081_v28, %v1082_v30  ;;  %v6062_v28 = vld [vmem:[#allocation3 + $0x2b0] sm:$0xff]   ;;  %v6064_v30 = vld [vmem:[#allocation3 + $0x2e8] sm:$0xff]  }
  0x6b   : > { %5669 = vmatpush3.bf16.msra.mxu0 %v6045_v3  ;;  %v6061_v3 = vld [vmem:[#allocation3 + $0x230] sm:$0xff]  }
  0x6c   : > { %5670 = vmatprep.subr.bf16.mxu0 %v6047_v6  ;;  %v1089_v6 = vsel %vm1077_vm2, %v1087_v32, %v1088_v34  ;;  %v2183_v32 = vrot.slane %v6872_v45, 2  ;;  %v6068_v34 = vld [vmem:[#allocation3 + $0x2e0] sm:$0xff]   ;;  %v6072_v45 = vld [vmem:[#allocation3 + $0x2d8] sm:$0xff]  }
  0x6d   : > { %5691 = vmatpush3.bf16.msra.mxu1 %v6046_v13  ;;  %v6065_v13 = vld [vmem:[#allocation3 + $0x228] sm:$0xff]  }
  0x6e   : > { %5692 = vmatprep.subr.bf16.mxu1 %v6048_v15  ;;  %v6066_v15 = vld [vmem:[#allocation3 + $0x2a8] sm:$0xff]  }
  0x6f   : > { %5671 = vmatpush3.bf16.msra.mxu0 %v6049_v17  ;;  %v6069_v17 = vld [vmem:[#allocation3 + $0x220] sm:$0xff]  }
  0x70   : > { %5672 = vmatprep.subr.bf16.mxu0 %v6051_v20  ;;  %v6992_v20 = vor.u32 %v2184_v16, %v2183_v32  ;;  %v6090_v32 = vld [vmem:[#allocation3 + $0x3b8] sm:$0xff]   ;;  %v6092_v16 = vld [vmem:[#allocation3 + $0x3f0] sm:$0xff]  }
  0x71   : > { %5693 = vmatpush3.bf16.msra.mxu1 %v6050_v22  ;;  %v2187_v22 = vrot.slane %v6878_v47, 3  ;;  %v2201_v47 = vrot.slane %v6891_v54, 3  ;;  %v2180_v54 = vrot.slane %v6907_v0, 3  ;;  %v2194_v0 = vrot.slane %v6926_v11, 3 }
  0x72   : > { %5694 = vmatprep.subr.bf16.mxu1 %v6052_v26  ;;  %v1085_v11 = vrot.slane %v6913_v4, 1 }
  0x73   : > { %5673 = vmatpush3.bf16.msra.mxu0 %v6053_v29  ;;  %v6996_v26 = vor.u32 %v2187_v22, %v2186_v18  ;;  %v6075_v29 = vld [vmem:[#allocation3 + $0x250] sm:$0xff]   ;;  %v7005_v38 = vor.u32 %v2201_v47, %v2200_v44  ;;  %v7014_v57 = vor.u32 %v2180_v54, %v2179_v5  ;;  %v6095_v18 = vld [vmem:[#allocation3 + $0x368] sm:$0xff]   ;;  %v6103_v44 = vld [vmem:[#allocation3 + $0x358] sm:$0xff]  }
  0x74   : > { %5702 = vmatprep.subr.bf16.mxu0 %v6055_v33  ;;  %v6074_v33 = vld [vmem:[#allocation3 + $0x298] sm:$0xff]   ;;  %v6096_v22 = vld [vmem:[#allocation3 + $0x3e8] sm:$0xff]   ;;  %v6115_v54 = vld [vmem:[#allocation3 + $0x340] sm:$0xff]  }
  0x75   : > { %5695 = vmatpush3.bf16.msra.mxu1 %v6054_v39  ;;  %v6077_v39 = vld [vmem:[#allocation3 + $0x210] sm:$0xff]   ;;  %v6105_v47 = vld [vmem:[#allocation3 + $0x318] sm:$0xff]   ;;  %v6112_v5 = vld [vmem:[#allocation3 + $0x3c8] sm:$0xff]  }
  0x76   : > { %955 = vmatmul.mubr.bf16.vlgmr.msra.gmra.mxu0 %v6880_v48  ;;  %5724 = vmatprep.subr.bf16.mxu1 %v6056_v43  ;;  %v6079_v43 = vld [vmem:[#allocation3 + $0x248] sm:$0xff]  }
  0x77   : > { %5703 = vmatpush3.bf16.msra.mxu0 %v6057_v56  ;;  %1318 = vmatprep.mubr.bf16.mxu0 %v1083_v62  ;;  %v6080_v56 = vld [vmem:[#allocation3 + $0x2c8] sm:$0xff]   ;;  %v7019_v62 = vor.u32 %v2191_v61, %v2190_v60  ;;  %v6116_v60 = vld [vmem:[#allocation3 + $0x3c0] sm:$0xff]   ;;  %v6119_v61 = vld [vmem:[#allocation3 + $0x478] sm:$0xff]  }
  0x78   : > { %5704 = vmatprep.subr.bf16.mxu0 %v6059_v58  ;;  %996 = vmatmul.mubr.bf16.vlgmr.msra.gmra.mxu1 %v6909_v1  ;;  %v6081_v58 = vld [vmem:[#allocation3 + $0x208] sm:$0xff]  }
  0x79   : > { %5725 = vmatpush3.bf16.msra.mxu1 %v6058_v59  ;;  %1359 = vmatprep.mubr.bf16.mxu1 %v1089_v6  ;;  %v6083_v59 = vld [vmem:[#allocation3 + $0x240] sm:$0xff]   ;;  %v1079_v6 = vrot.slane %v6893_v55, 1 }
  0x7a   : > { %5726 = vmatprep.subr.bf16.mxu1 %v6060_v2  ;;  %v1078_v2 = vrot.slane %v6880_v48, 1 }
  0x7b   : > { %5705 = vmatpush3.bf16.msra.mxu0 %v6061_v3  ;;  %v7023_v3 = vor.u32 %v2194_v0, %v2193_v21  ;;  %v6118_v21 = vld [vmem:[#allocation3 + $0x380] sm:$0xff]   ;;  %v6120_v0 = vld [vmem:[#allocation3 + $0x4f8] sm:$0xff]  }
  0x7c   : > { %5706 = vmatprep.subr.bf16.mxu0 %v6063_v12  ;;  %v6086_v12 = vld [vmem:[#allocation3 + $0x280] sm:$0xff]  }
  0x7d   : > { %5727 = vmatpush3.bf16.msra.mxu1 %v6062_v28  ;;  %v1084_v28 = vrot.slane %v6909_v1, 1 }
  0x7e   : > { %5728 = vmatprep.subr.bf16.mxu1 %v6064_v30  ;;  %v6088_v30 = vld [vmem:[#allocation3 + $0x3f8] sm:$0xff]  }
  0x7f   : > { %5707 = vmatpush3.bf16.msra.mxu0 %v6065_v13  ;;  %v1080_v13 = vsel %vm1077_vm2, %v1078_v2, %v1079_v6  ;;  %v1828_v2 = vrot.slane %v6866_v41, 2  ;;  %v6122_v6 = vld [vmem:[#allocation3 + $0x4b8] sm:$0xff]  }
  0x80   : > { %5708 = vmatprep.subr.bf16.mxu0 %v6067_v14  ;;  %v6089_v14 = vld [vmem:[#allocation3 + $0x338] sm:$0xff]  }
  0x81   : > { %5729 = vmatpush3.bf16.msra.mxu1 %v6066_v15  ;;  %v6091_v15 = vld [vmem:[#allocation3 + $0x370] sm:$0xff]  }
  0x82   : > { %5730 = vmatprep.subr.bf16.mxu1 %v6068_v34  ;;  %v1086_v34 = vsel %vm1077_vm2, %v1084_v28, %v1085_v11  ;;  %v6125_v28 = vld [vmem:[#allocation3 + $0x430] sm:$0xff]  }
  0x83   : > { %5709 = vmatpush3.bf16.msra.mxu0 %v6069_v17  ;;  %v6093_v17 = vld [vmem:[#allocation3 + $0x330] sm:$0xff]  }
  0x84   : > { %5710 = vmatprep.subr.bf16.mxu0 %v6071_v19  ;;  %v6094_v19 = vld [vmem:[#allocation3 + $0x3b0] sm:$0xff]  }
  0x85   : > { %5731 = vmatpush3.bf16.msra.mxu1 %v6070_v24  ;;  %v6097_v24 = vld [vmem:[#allocation3 + $0x328] sm:$0xff]  }
  0x86   : > { %5732 = vmatprep.subr.bf16.mxu1 %v6072_v45  ;;  %v6098_v45 = vld [vmem:[#allocation3 + $0x3a8] sm:$0xff]  }
  0x87   : > { %5711 = vmatpush3.bf16.msra.mxu0 %v6073_v27  ;;  %v6101_v27 = vld [vmem:[#allocation3 + $0x320] sm:$0xff]  }
  0x88   : > { %5712 = vmatprep.subr.bf16.mxu0 %v6075_v29  ;;  %v6104_v29 = vld [vmem:[#allocation3 + $0x3d8] sm:$0xff]  }
  0x89   : > { %5733 = vmatpush3.bf16.msra.mxu1 %v6074_v33  ;;  %v6106_v33 = vld [vmem:[#allocation3 + $0x398] sm:$0xff]  }
  0x8a   : > { %5734 = vmatprep.subr.bf16.mxu1 %v6076_v37  ;;  %v6109_v37 = vld [vmem:[#allocation3 + $0x310] sm:$0xff]  }
  0x8b   : > { %5713 = vmatpush3.bf16.msra.mxu0 %v6077_v39  ;;  %v6110_v39 = vld [vmem:[#allocation3 + $0x390] sm:$0xff]  }
  0x8c   : > { %5714 = vmatprep.subr.bf16.mxu0 %v6079_v43  ;;  %v6113_v43 = vld [vmem:[#allocation3 + $0x308] sm:$0xff]  }
  0x8d   : > { %5735 = vmatpush3.bf16.msra.mxu1 %v6078_v51  ;;  %v6114_v51 = vld [vmem:[#allocation3 + $0x388] sm:$0xff]  }
  0x8e   : > { %5736 = vmatprep.subr.bf16.mxu1 %v6080_v56  ;;  %v6117_v56 = vld [vmem:[#allocation3 + $0x300] sm:$0xff]  }
  0x8f   : > { %5715 = vmatpush3.bf16.msra.mxu0 %v6081_v58  ;;  %v1821_v58 = vrot.slane %v6857_v35, 2 }
  0x90   : > { %5716 = vmatprep.subr.bf16.mxu0 %v6083_v59  ;;  %v1822_v59 = vrot.slane %v6859_v36, 2 }
  0x91   : > { %5737 = vmatpush3.bf16.msra.mxu1 %v6082_v63  ;;  %v1827_v63 = vrot.slane %v6864_v40, 2 }
  0x92   : > { %5738 = vmatprep.subr.bf16.mxu1 %v6084_v7  ;;  %v6121_v7 = vld [vmem:[#allocation3 + $0x438] sm:$0xff]  }
  0x93   : > { %5717 = vmatpush3.bf16.msra.mxu0 %v6085_v8  ;;  %v6123_v8 = vld [vmem:[#allocation3 + $0x470] sm:$0xff]   ;;  %v1829_v11 = vsel %vm1817_vm3, %v1827_v63, %v1828_v2  ;;  %v6161_v2 = vld [vmem:[#allocation3 + $0x528] sm:$0xff]  }
  0x94   : > { %5746 = vmatprep.subr.bf16.mxu0 %v6087_v42  ;;  %v1823_v42 = vsel %vm1817_vm3, %v1821_v58, %v1822_v59  ;;  %v6157_v59 = vld [vmem:[#allocation3 + $0x530] sm:$0xff]  }
  0x95   : > { %5739 = vmatpush3.bf16.msra.mxu1 %v6086_v12  ;;  %v6124_v12 = vld [vmem:[#allocation3 + $0x4f0] sm:$0xff]  }
  0x96   : > { %1319 = vmatmul.mubr.bf16.vlgmr.msra.gmra.mxu0 %v1080_v13  ;;  %5768 = vmatprep.subr.bf16.mxu1 %v6088_v30  ;;  %v6127_v30 = vld [vmem:[#allocation3 + $0x468] sm:$0xff]   ;;  %v6126_v13 = vld [vmem:[#allocation3 + $0x4b0] sm:$0xff]  }
  0x97   : > { %5747 = vmatpush3.bf16.msra.mxu0 %v6089_v14  ;;  %1700 = vmatprep.mubr.bf16.mxu0 %v6950_v9  ;;  %v6102_v9 = vld [vmem:[#allocation3 + $0x3a0] sm:$0xff]   ;;  %v6128_v14 = vld [vmem:[#allocation3 + $0x4e8] sm:$0xff]   ;;  %v6158_v63 = vld [vmem:[#allocation3 + $0x5b0] sm:$0xff]  }
  0x98   : > { %5748 = vmatprep.subr.bf16.mxu0 %v6091_v15  ;;  %1360 = vmatmul.mubr.bf16.vlgmr.msra.gmra.mxu1 %v1086_v34  ;;  %v6129_v15 = vld [vmem:[#allocation3 + $0x428] sm:$0xff]   ;;  %v6132_v34 = vld [vmem:[#allocation3 + $0x4e0] sm:$0xff]  }
  0x99   : > { %5769 = vmatpush3.bf16.msra.mxu1 %v6090_v32  ;;  %1741 = vmatprep.mubr.bf16.mxu1 %v6959_v23  ;;  %v6107_v23 = vld [vmem:[#allocation3 + $0x350] sm:$0xff]   ;;  %v6130_v32 = vld [vmem:[#allocation3 + $0x4a8] sm:$0xff]  }
  0x9a   : > { %5770 = vmatprep.subr.bf16.mxu1 %v6092_v16  ;;  %v6133_v16 = vld [vmem:[#allocation3 + $0x420] sm:$0xff]  }
  0x9b   : > { %5749 = vmatpush3.bf16.msra.mxu0 %v6093_v17  ;;  %v6135_v17 = vld [vmem:[#allocation3 + $0x458] sm:$0xff]  }
  0x9c   : > { %5750 = vmatprep.subr.bf16.mxu0 %v6095_v18  ;;  %v6134_v18 = vld [vmem:[#allocation3 + $0x4a0] sm:$0xff]  }
  0x9d   : > { %5771 = vmatpush3.bf16.msra.mxu1 %v6094_v19  ;;  %v6137_v19 = vld [vmem:[#allocation3 + $0x418] sm:$0xff]  }
  0x9e   : > { %5772 = vmatprep.subr.bf16.mxu1 %v6096_v22  ;;  %v6139_v22 = vld [vmem:[#allocation3 + $0x450] sm:$0xff]  }
  0x9f   : > { %5751 = vmatpush3.bf16.msra.mxu0 %v6097_v24  ;;  %v6138_v24 = vld [vmem:[#allocation3 + $0x498] sm:$0xff]  }
  0xa0   : > { %5752 = vmatprep.subr.bf16.mxu0 %v6099_v25  ;;  %v6140_v25 = vld [vmem:[#allocation3 + $0x4d0] sm:$0xff]  }
  0xa1   : > { %5773 = vmatpush3.bf16.msra.mxu1 %v6098_v45  ;;  %v6141_v45 = vld [vmem:[#allocation3 + $0x410] sm:$0xff]  }
  0xa2   : > { %5774 = vmatprep.subr.bf16.mxu1 %v6100_v46  ;;  %v6143_v46 = vld [vmem:[#allocation3 + $0x448] sm:$0xff]  }
  0xa3   : > { %5753 = vmatpush3.bf16.msra.mxu0 %v6101_v27  ;;  %v6142_v27 = vld [vmem:[#allocation3 + $0x490] sm:$0xff]  }
  0xa4   : > { %5754 = vmatprep.subr.bf16.mxu0 %v6103_v44  ;;  %v6144_v44 = vld [vmem:[#allocation3 + $0x4c8] sm:$0xff]  }
  0xa5   : > { %5775 = vmatpush3.bf16.msra.mxu1 %v6102_v9  ;;  %v6145_v9 = vld [vmem:[#allocation3 + $0x408] sm:$0xff]  }
  0xa6   : > { %5776 = vmatprep.subr.bf16.mxu1 %v6104_v29  ;;  %v6147_v29 = vld [vmem:[#allocation3 + $0x440] sm:$0xff]  }
  0xa7   : > { %5755 = vmatpush3.bf16.msra.mxu0 %v6105_v47  ;;  %v6146_v47 = vld [vmem:[#allocation3 + $0x488] sm:$0xff]  }
  0xa8   : > { %5756 = vmatprep.subr.bf16.mxu0 %v6107_v23  ;;  %v6148_v23 = vld [vmem:[#allocation3 + $0x4c0] sm:$0xff]  }
  0xa9   : > { %5777 = vmatpush3.bf16.msra.mxu1 %v6106_v33  ;;  %v1818_v33 = vrot.slane %v6880_v48, 2 }
  0xaa   : > { %5778 = vmatprep.subr.bf16.mxu1 %v6108_v52  ;;  %v6149_v52 = vld [vmem:[#allocation3 + $0x400] sm:$0xff]  }
  0xab   : > { %5757 = vmatpush3.bf16.msra.mxu0 %v6109_v37  ;;  %v1819_v37 = vrot.slane %v6893_v55, 2 }
  0xac   : > { %5758 = vmatprep.subr.bf16.mxu0 %v6111_v53  ;;  %v6151_v53 = vld [vmem:[#allocation3 + $0x578] sm:$0xff]  }
  0xad   : > { %5779 = vmatpush3.bf16.msra.mxu1 %v6110_v39  ;;  %v6150_v39 = vld [vmem:[#allocation3 + $0x480] sm:$0xff]  }
  0xae   : > { %5780 = vmatprep.subr.bf16.mxu1 %v6112_v5  ;;  %v1824_v5 = vrot.slane %v6909_v1, 2 }
  0xaf   : > { %5759 = vmatpush3.bf16.msra.mxu0 %v6113_v43  ;;  %v1825_v43 = vrot.slane %v6913_v4, 2 }
  0xb0   : > { %5760 = vmatprep.subr.bf16.mxu0 %v6115_v54  ;;  %v6152_v54 = vld [vmem:[#allocation3 + $0x5f8] sm:$0xff]  }
  0xb1   : > { %5781 = vmatpush3.bf16.msra.mxu1 %v6114_v51  ;;  %v1820_v51 = vsel %vm1817_vm3, %v1818_v33, %v1819_v37  ;;  %v1826_v58 = vsel %vm1817_vm3, %v1824_v5, %v1825_v43  ;;  %v6193_v33 = vld [vmem:[#allocation3 + $0x628] sm:$0xff]   ;;  %v6199_v5 = vld [vmem:[#allocation3 + $0x658] sm:$0xff]   ;;  %v6198_v43 = vld [vmem:[#allocation3 + $0x6a0] sm:$0xff]  }
  0xb2   : > { %5782 = vmatprep.subr.bf16.mxu1 %v6116_v60  ;;  %v6153_v60 = vld [vmem:[#allocation3 + $0x538] sm:$0xff]   ;;  %v6194_v37 = vld [vmem:[#allocation3 + $0x6a8] sm:$0xff]  }
  0xb3   : > { %5761 = vmatpush3.bf16.msra.mxu0 %v6117_v56  ;;  %v6155_v56 = vld [vmem:[#allocation3 + $0x570] sm:$0xff]  }
  0xb4   : > { %5790 = vmatprep.subr.bf16.mxu0 %v6119_v61  ;;  %v6154_v61 = vld [vmem:[#allocation3 + $0x5b8] sm:$0xff]  }
  0xb5   : > { %5783 = vmatpush3.bf16.msra.mxu1 %v6118_v21  ;;  %v6156_v21 = vld [vmem:[#allocation3 + $0x5f0] sm:$0xff]  }
  0xb6   : > { %1701 = vmatmul.mubr.bf16.vlgmr.msra.gmra.mxu0 %v6968_v49  ;;  %5812 = vmatprep.subr.bf16.mxu1 %v6120_v0  ;;  %v6131_v49 = vld [vmem:[#allocation3 + $0x460] sm:$0xff]   ;;  %v6159_v0 = vld [vmem:[#allocation3 + $0x568] sm:$0xff]  }
  0xb7   : > { %5791 = vmatpush3.bf16.msra.mxu0 %v6121_v7  ;;  %2058 = vmatprep.mubr.bf16.mxu0 %v1823_v42  ;;  %v6160_v7 = vld [vmem:[#allocation3 + $0x5e8] sm:$0xff]   ;;  %v6164_v42 = vld [vmem:[#allocation3 + $0x5e0] sm:$0xff]  }
  0xb8   : > { %5792 = vmatprep.subr.bf16.mxu0 %v6123_v8  ;;  %1742 = vmatmul.mubr.bf16.vlgmr.msra.gmra.mxu1 %v6985_v10  ;;  %v6136_v10 = vld [vmem:[#allocation3 + $0x4d8] sm:$0xff]   ;;  %v6163_v8 = vld [vmem:[#allocation3 + $0x560] sm:$0xff]  }
  0xb9   : > { %5813 = vmatpush3.bf16.msra.mxu1 %v6122_v6  ;;  %2099 = vmatprep.mubr.bf16.mxu1 %v1829_v11  ;;  %v6162_v6 = vld [vmem:[#allocation3 + $0x5a8] sm:$0xff]   ;;  %v6166_v11 = vld [vmem:[#allocation3 + $0x5a0] sm:$0xff]  }
  0xba   : > { %5814 = vmatprep.subr.bf16.mxu1 %v6124_v12  ;;  %v6165_v12 = vld [vmem:[#allocation3 + $0x520] sm:$0xff]  }
  0xbb   : > { %5793 = vmatpush3.bf16.msra.mxu0 %v6125_v28  ;;  %v6167_v28 = vld [vmem:[#allocation3 + $0x558] sm:$0xff]  }
  0xbc   : > { %5794 = vmatprep.subr.bf16.mxu0 %v6127_v30  ;;  %v6168_v30 = vld [vmem:[#allocation3 + $0x5d8] sm:$0xff]  }
  0xbd   : > { %5815 = vmatpush3.bf16.msra.mxu1 %v6126_v13  ;;  %v6169_v13 = vld [vmem:[#allocation3 + $0x518] sm:$0xff]  }
  0xbe   : > { %5816 = vmatprep.subr.bf16.mxu1 %v6128_v14  ;;  %v6171_v14 = vld [vmem:[#allocation3 + $0x550] sm:$0xff]  }
  0xbf   : > { %5795 = vmatpush3.bf16.msra.mxu0 %v6129_v15  ;;  %v6170_v15 = vld [vmem:[#allocation3 + $0x598] sm:$0xff]  }
  0xc0   : > { %5796 = vmatprep.subr.bf16.mxu0 %v6131_v49  ;;  %v6172_v49 = vld [vmem:[#allocation3 + $0x5d0] sm:$0xff]  }
  0xc1   : > { %5817 = vmatpush3.bf16.msra.mxu1 %v6130_v32  ;;  %v6173_v32 = vld [vmem:[#allocation3 + $0x510] sm:$0xff]  }
  0xc2   : > { %5818 = vmatprep.subr.bf16.mxu1 %v6132_v34  ;;  %v6175_v34 = vld [vmem:[#allocation3 + $0x548] sm:$0xff]  }
  0xc3   : > { %5797 = vmatpush3.bf16.msra.mxu0 %v6133_v16  ;;  %v6174_v16 = vld [vmem:[#allocation3 + $0x590] sm:$0xff]  }
  0xc4   : > { %5798 = vmatprep.subr.bf16.mxu0 %v6135_v17  ;;  %v6176_v17 = vld [vmem:[#allocation3 + $0x5c8] sm:$0xff]  }
  0xc5   : > { %5819 = vmatpush3.bf16.msra.mxu1 %v6134_v18  ;;  %v6177_v18 = vld [vmem:[#allocation3 + $0x508] sm:$0xff]  }
  0xc6   : > { %5820 = vmatprep.subr.bf16.mxu1 %v6136_v10  ;;  %v6179_v10 = vld [vmem:[#allocation3 + $0x540] sm:$0xff]  }
  0xc7   : > { %5799 = vmatpush3.bf16.msra.mxu0 %v6137_v19  ;;  %v6178_v19 = vld [vmem:[#allocation3 + $0x588] sm:$0xff]  }
  0xc8   : > { %5800 = vmatprep.subr.bf16.mxu0 %v6139_v22  ;;  %v2553_v22 = vrot.slane %v6857_v35, 3  ;;  %v2196_v35 = vsel %vm2175_vm5, %v7019_v62, %v7023_v3  ;;  %v6190_v3 = vld [vmem:[#allocation3 + $0x6b0] sm:$0xff]  }
  0xc9   : > { %5821 = vmatpush3.bf16.msra.mxu1 %v6138_v24  ;;  %v6180_v24 = vld [vmem:[#allocation3 + $0x5c0] sm:$0xff]  }
  0xca   : > { %5822 = vmatprep.subr.bf16.mxu1 %v6140_v25  ;;  %v6181_v25 = vld [vmem:[#allocation3 + $0x500] sm:$0xff]  }
  0xcb   : > { %5801 = vmatpush3.bf16.msra.mxu0 %v6141_v45  ;;  %v6183_v45 = vld [vmem:[#allocation3 + $0x678] sm:$0xff]  }
  0xcc   : > { %5802 = vmatprep.subr.bf16.mxu0 %v6143_v46  ;;  %v2189_v46 = vsel %vm2175_vm5, %v6992_v20, %v6996_v26  ;;  %v6185_v20 = vld [vmem:[#allocation3 + $0x638] sm:$0xff]   ;;  %v2560_v26 = vrot.slane %v6866_v41, 3  ;;  %v6192_v41 = vld [vmem:[#allocation3 + $0x6e8] sm:$0xff]  }
  0xcd   : > { %5823 = vmatpush3.bf16.msra.mxu1 %v6142_v27  ;;  %v2203_v27 = vsel %vm2175_vm5, %v7001_v31, %v7005_v38  ;;  %v6187_v31 = vld [vmem:[#allocation3 + $0x670] sm:$0xff]   ;;  %v6186_v38 = vld [vmem:[#allocation3 + $0x6b8] sm:$0xff]  }
  0xce   : > { %5824 = vmatprep.subr.bf16.mxu1 %v6144_v44  ;;  %v2182_v44 = vsel %vm2175_vm5, %v7010_v50, %v7014_v57  ;;  %v6188_v57 = vld [vmem:[#allocation3 + $0x6f0] sm:$0xff]  }
  0xcf   : > { %5803 = vmatpush3.bf16.msra.mxu0 %v6145_v9  ;;  %v6182_v9 = vld [vmem:[#allocation3 + $0x580] sm:$0xff]  }
  0xd0   : > { %5804 = vmatprep.subr.bf16.mxu0 %v6147_v29  ;;  %v2554_v29 = vrot.slane %v6859_v36, 3  ;;  %v6189_v36 = vld [vmem:[#allocation3 + $0x630] sm:$0xff]  }
  0xd1   : > { %5825 = vmatpush3.bf16.msra.mxu1 %v6146_v47  ;;  %v6184_v47 = vld [vmem:[#allocation3 + $0x6f8] sm:$0xff]  }
  0xd2   : > { %5826 = vmatprep.subr.bf16.mxu1 %v6148_v23  ;;  %v2559_v23 = vrot.slane %v6864_v40, 3  ;;  %v2555_v50 = vsel %vm2549_vm4, %v2553_v22, %v2554_v29  ;;  %v6191_v40 = vld [vmem:[#allocation3 + $0x668] sm:$0xff]  }
  0xd3   : > { %5805 = vmatpush3.bf16.msra.mxu0 %v6149_v52  ;;  %v6195_v52 = vld [vmem:[#allocation3 + $0x660] sm:$0xff]   ;;  %v6238_v22 = vld [vmem:[#allocation6 + $0x18c] ss:$16 sps:$4 sm:$0xff]  }
  0xd4   : > { %5834 = vmatprep.subr.bf16.mxu0 %v6151_v53  ;;  %v2561_v62 = vsel %vm2549_vm4, %v2559_v23, %v2560_v26  ;;  %v6196_v53 = vld [vmem:[#allocation3 + $0x6e0] sm:$0xff]   ;;  %v6250_v29 = vld [vmem:[#allocation6 + $0x14c] ss:$16 sps:$4 sm:$0xff]   ;;  %v6248_v23 = vld [vmem:[#allocation6 + $0x148] ss:$16 sps:$4 sm:$0xff]  }
  0xd5   : > { %5827 = vmatpush3.bf16.msra.mxu1 %v6150_v39  ;;  %v6197_v39 = vld [vmem:[#allocation3 + $0x620] sm:$0xff]   ;;  %v6256_v26 = vld [vmem:[#allocation6 + $0x12c] ss:$16 sps:$4 sm:$0xff]  }
  0xd6   : > { %2059 = vmatmul.mubr.bf16.vlgmr.msra.gmra.mxu0 %v1820_v51  ;;  %5856 = vmatprep.subr.bf16.mxu1 %v6152_v54  ;;  %v6200_v54 = vld [vmem:[#allocation3 + $0x6d8] sm:$0xff]  }
  0xd7   : > { %5835 = vmatpush3.bf16.msra.mxu0 %v6153_v60  ;;  %2432 = vmatprep.mubr.bf16.mxu0 %v2189_v46  ;;  %v6201_v51 = vld [vmem:[#allocation3 + $0x618] sm:$0xff]   ;;  %v6203_v60 = vld [vmem:[#allocation3 + $0x650] sm:$0xff]  }
  0xd8   : > { %5836 = vmatprep.subr.bf16.mxu0 %v6155_v56  ;;  %2100 = vmatmul.mubr.bf16.vlgmr.msra.gmra.mxu1 %v1826_v58  ;;  %v6202_v56 = vld [vmem:[#allocation3 + $0x698] sm:$0xff]   ;;  %v6205_v58 = vld [vmem:[#allocation3 + $0x610] sm:$0xff]  }
  0xd9   : > { %5857 = vmatpush3.bf16.msra.mxu1 %v6154_v61  ;;  %2473 = vmatprep.mubr.bf16.mxu1 %v2203_v27  ;;  %v6204_v61 = vld [vmem:[#allocation3 + $0x6d0] sm:$0xff]   ;;  %v6244_v46 = vld [vmem:[#allocation6 + $0x16c] ss:$16 sps:$4 sm:$0xff]  }
  0xda   : > { %5858 = vmatprep.subr.bf16.mxu1 %v6156_v21  ;;  %v6207_v21 = vld [vmem:[#allocation3 + $0x648] sm:$0xff]   ;;  %v6239_v27 = vld [vmem:[#allocation6 + $0x160] ss:$16 sps:$4 sm:$0xff]  }
  0xdb   : > { %5837 = vmatpush3.bf16.msra.mxu0 %v6157_v59  ;;  %v6206_v59 = vld [vmem:[#allocation3 + $0x690] sm:$0xff]  }
  0xdc   : > { %5838 = vmatprep.subr.bf16.mxu0 %v6159_v0  ;;  %v6208_v0 = vld [vmem:[#allocation3 + $0x6c8] sm:$0xff]  }
  0xdd   : > { %5859 = vmatpush3.bf16.msra.mxu1 %v6158_v63  ;;  %v6209_v63 = vld [vmem:[#allocation3 + $0x608] sm:$0xff]  }
  0xde   : > { %5860 = vmatprep.subr.bf16.mxu1 %v6160_v7  ;;  %v6211_v7 = vld [vmem:[#allocation3 + $0x640] sm:$0xff]  }
  0xdf   : > { %5839 = vmatpush3.bf16.msra.mxu0 %v6161_v2  ;;  %v6210_v2 = vld [vmem:[#allocation3 + $0x688] sm:$0xff]  }
  0xe0   : > { %5840 = vmatprep.subr.bf16.mxu0 %v6163_v8  ;;  %v6212_v8 = vld [vmem:[#allocation3 + $0x6c0] sm:$0xff]  }
  0xe1   : > { %5861 = vmatpush3.bf16.msra.mxu1 %v6162_v6  ;;  %v6213_v6 = vld [vmem:[#allocation3 + $0x600] sm:$0xff]  }
  0xe2   : > { %5862 = vmatprep.subr.bf16.mxu1 %v6164_v42  ;;  %v2550_v42 = vrot.slane %v6880_v48, 3  ;;  %v6217_v48 = vld [vmem:[#allocation6 + $0x1e4] ss:$16 sps:$4 sm:$0xff]  }
  0xe3   : > { %5841 = vmatpush3.bf16.msra.mxu0 %v6165_v12  ;;  %v2551_v12 = vrot.slane %v6893_v55, 3  ;;  %v6220_v55 = vld [vmem:[#allocation6 + $0x1ec] ss:$16 sps:$4 sm:$0xff]  }
  0xe4   : > { %5842 = vmatprep.subr.bf16.mxu0 %v6167_v28  ;;  %v6214_v28 = vld [vmem:[#allocation3 + $0x680] sm:$0xff]  }
  0xe5   : > { %5863 = vmatpush3.bf16.msra.mxu1 %v6166_v11  ;;  %v2556_v11 = vrot.slane %v6909_v1, 3  ;;  %v6226_v1 = vld [vmem:[#allocation6 + $0x1cc] ss:$16 sps:$4 sm:$0xff]  }
  0xe6   : > { %5864 = vmatprep.subr.bf16.mxu1 %v6168_v30  ;;  %v2557_v30 = vrot.slane %v6913_v4, 3  ;;  %v6229_v4 = vld [vmem:[#allocation6 + $0x1a4] ss:$16 sps:$4 sm:$0xff]  }
  0xe7   : > { %5843 = vmatpush3.bf16.msra.mxu0 %v6169_v13  ;;  %v2552_v13 = vsel %vm2549_vm4, %v2550_v42, %v2551_v12 }
  0xe8   : > { %5844 = vmatprep.subr.bf16.mxu0 %v6171_v14  ;;  %v2558_v14 = vsel %vm2549_vm4, %v2556_v11, %v2557_v30 }
  0xe9   : > { %5865 = vmatpush3.bf16.msra.mxu1 %v6170_v15  ;;  %v6215_v15 = vld [vmem:[#allocation6 + $0x1e0] ss:$16 sps:$4 sm:$0xff]  }
  0xea   : > { %5866 = vmatprep.subr.bf16.mxu1 %v6172_v49  ;;  %v6218_v49 = vld [vmem:[#allocation6 + $0x1e8] ss:$16 sps:$4 sm:$0xff]  }
  0xeb   : > { %5845 = vmatpush3.bf16.msra.mxu0 %v6173_v32  ;;  %v6221_v32 = vld [vmem:[#allocation6 + $0x1c0] ss:$16 sps:$4 sm:$0xff]  }
  0xec   : > { %5846 = vmatprep.subr.bf16.mxu0 %v6175_v34  ;;  %v6223_v34 = vld [vmem:[#allocation6 + $0x1c4] ss:$16 sps:$4 sm:$0xff]  }
  0xed   : > { %5867 = vmatpush3.bf16.msra.mxu1 %v6174_v16  ;;  %v6224_v16 = vld [vmem:[#allocation6 + $0x1c8] ss:$16 sps:$4 sm:$0xff]  }
  0xee   : > { %5868 = vmatprep.subr.bf16.mxu1 %v6176_v17  ;;  %v6232_v17 = vld [vmem:[#allocation6 + $0x1ac] ss:$16 sps:$4 sm:$0xff]  }
  0xef   : > { %5847 = vmatpush3.bf16.msra.mxu0 %v6177_v18  ;;  %v6227_v18 = vld [vmem:[#allocation6 + $0x1a0] ss:$16 sps:$4 sm:$0xff]  }
  0xf0   : > { %5848 = vmatprep.subr.bf16.mxu0 %v6179_v10  ;;  %v6230_v10 = vld [vmem:[#allocation6 + $0x1a8] ss:$16 sps:$4 sm:$0xff]  }
  0xf1   : > { %5869 = vmatpush3.bf16.msra.mxu1 %v6178_v19  ;;  %v6235_v19 = vld [vmem:[#allocation6 + $0x184] ss:$16 sps:$4 sm:$0xff]  }
  0xf2   : > { %5870 = vmatprep.subr.bf16.mxu1 %v6180_v24  ;;  %v6233_v24 = vld [vmem:[#allocation6 + $0x180] ss:$16 sps:$4 sm:$0xff]  }
  0xf3   : > { %5849 = vmatpush3.bf16.msra.mxu0 %v6181_v25  ;;  %v6236_v25 = vld [vmem:[#allocation6 + $0x188] ss:$16 sps:$4 sm:$0xff]  }
  0xf4   : > { %5878 = vmatprep.subr.bf16.mxu0 %v6183_v45  ;;  %v6241_v45 = vld [vmem:[#allocation6 + $0x164] ss:$16 sps:$4 sm:$0xff]  }
  0xf5   : > { %5871 = vmatpush3.bf16.msra.mxu1 %v6182_v9  ;;  %v6247_v9 = vld [vmem:[#allocation6 + $0x144] ss:$16 sps:$4 sm:$0xff]  }
  0xf6   : > { %2433 = vmatmul.mubr.bf16.vlgmr.msra.gmra.mxu0 %v2182_v44  ;;  %5900 = vmatprep.subr.bf16.mxu1 %v6184_v47  ;;  %v6242_v44 = vld [vmem:[#allocation6 + $0x168] ss:$16 sps:$4 sm:$0xff]   ;;  %v6245_v47 = vld [vmem:[#allocation6 + $0x140] ss:$16 sps:$4 sm:$0xff]  }
  0xf7   : > { %5879 = vmatpush3.bf16.msra.mxu0 %v6185_v20  ;;  %2790 = vmatprep.mubr.bf16.mxu0 %v2555_v50  ;;  %v6253_v20 = vld [vmem:[#allocation6 + $0x124] ss:$16 sps:$4 sm:$0xff]  }
  0xf8   : > { %5880 = vmatprep.subr.bf16.mxu0 %v6187_v31  ;;  %2474 = vmatmul.mubr.bf16.vlgmr.msra.gmra.mxu1 %v2196_v35  ;;  %v6723_v35 = vmov 0.0   ;;  %v6251_v31 = vld [vmem:[#allocation6 + $0x120] ss:$16 sps:$4 sm:$0xff]   ;;  %v6259_v50 = vld [vmem:[#allocation6 + $0x104] ss:$16 sps:$4 sm:$0xff]  }
  0xf9   : > { %5901 = vmatpush3.bf16.msra.mxu1 %v6186_v38  ;;  %2831 = vmatprep.mubr.bf16.mxu1 %v2561_v62  ;;  %2853 = vst [vmem:[#allocation2] sm:$0xff] %v6723_v35  ;;  %2854 = vst [vmem:[#allocation2 + $0x8] sm:$0xff] %v6723_v35  ;;  %v6254_v38 = vld [vmem:[#allocation6 + $0x128] ss:$16 sps:$4 sm:$0xff]  }
  0xfa   : > { %5902 = vmatprep.subr.bf16.mxu1 %v6188_v57  ;;  %2855 = vst [vmem:[#allocation2 + $0x10] sm:$0x3f] %v6723_v35  ;;  %v6262_v57 = vld [vmem:[#allocation6 + $0x10c] ss:$16 sps:$4 sm:$0xff]   ;;  %v6260_v62 = vld [vmem:[#allocation6 + $0x108] ss:$16 sps:$4 sm:$0xff]  }
  0xfb   : > { %5881 = vmatpush3.bf16.msra.mxu0 %v6189_v36  ;;  %v6257_v36 = vld [vmem:[#allocation6 + $0x100] ss:$16 sps:$4 sm:$0xff]  }
  0xfc   : > { %5882 = vmatprep.subr.bf16.mxu0 %v6191_v40  ;;  %v6265_v40 = vld [vmem:[#allocation6 + $0xe4] ss:$16 sps:$4 sm:$0xff]  }
  0xfd   : > { %5903 = vmatpush3.bf16.msra.mxu1 %v6190_v3  ;;  %v6268_v3 = vld [vmem:[#allocation6 + $0xec] ss:$16 sps:$4 sm:$0xff]  }
  0xfe   : > { %5904 = vmatprep.subr.bf16.mxu1 %v6192_v41  ;;  %v6724_v41 = vmov 0  }
  0xff   : > { %5883 = vmatpush3.bf16.msra.mxu0 %v6193_v33 }
 0x100   : > { %5884 = vmatprep.subr.bf16.mxu0 %v6195_v52 }
 0x101   : > { %5905 = vmatpush3.bf16.msra.mxu1 %v6194_v37 }
 0x102   : > { %5906 = vmatprep.subr.bf16.mxu1 %v6196_v53 }
 0x103   : > { %5885 = vmatpush3.bf16.msra.mxu0 %v6197_v39 }
 0x104   : > { %5886 = vmatprep.subr.bf16.mxu0 %v6199_v5 }
 0x105   : > { %5907 = vmatpush3.bf16.msra.mxu1 %v6198_v43 }
 0x106   : > { %5908 = vmatprep.subr.bf16.mxu1 %v6200_v54 }
 0x107   : > { %5887 = vmatpush3.bf16.msra.mxu0 %v6201_v51 }
 0x108   : > { %5888 = vmatprep.subr.bf16.mxu0 %v6203_v60 }
 0x109   : > { %5909 = vmatpush3.bf16.msra.mxu1 %v6202_v56 }
 0x10a   : > { %5910 = vmatprep.subr.bf16.mxu1 %v6204_v61 }
 0x10b   : > { %5889 = vmatpush3.bf16.msra.mxu0 %v6205_v58 }
 0x10c   : > { %5890 = vmatprep.subr.bf16.mxu0 %v6207_v21 }
 0x10d   : > { %5911 = vmatpush3.bf16.msra.mxu1 %v6206_v59 }
 0x10e   : > { %5912 = vmatprep.subr.bf16.mxu1 %v6208_v0 }
 0x10f   : > { %5891 = vmatpush3.bf16.msra.mxu0 %v6209_v63 }
 0x110   : > { %5892 = vmatprep.subr.bf16.mxu0 %v6211_v7 }
 0x111   : > { %5913 = vmatpush3.bf16.msra.mxu1 %v6210_v2 }
 0x112   : > { %5914 = vmatprep.subr.bf16.mxu1 %v6212_v8 }
 0x113   : > { %5893 = vmatpush3.bf16.msra.mxu0 %v6213_v6 }
 0x114   : > { %3089 = vmatprep.subr.bf16.mxu0 %v6217_v48 }
 0x115   : > { %5915 = vmatpush3.bf16.msra.mxu1 %v6214_v28 }
 0x116   : > { %2791 = vmatmul.mubr.bf16.vlgmr.msra.gmra.mxu0 %v2552_v13  ;;  %3132 = vmatprep.subr.bf16.mxu1 %v6220_v55  ;;  %v5630_v33 = vpop.f32.mrf.mxu0 }
 0x117   : > { %3090 = vmatpush1.bf16.msra.mxu0 %v6215_v15  ;;  %3121 = vmatprep.mubr.bf16.mxu0 %v6724_v41 }
 0x118   : > { %2832 = vmatmul.mubr.bf16.vlgmr.msra.gmra.mxu1 %v2558_v14  ;;  %3091 = vmatprep.subr.bf16.mxu0 %v6223_v34  ;;  %v5652_v52 = vpop.f32.mrf.mxu1  ;;  %v5631_v37 = vpop.f32.mrf.mxu0 }
 0x119   : > { %3133 = vmatpush1.bf16.msra.mxu1 %v6218_v49  ;;  %3164 = vmatprep.mubr.bf16.mxu1 %v6724_v41 }
 0x11a   : > { %3134 = vmatprep.subr.bf16.mxu1 %v6226_v1  ;;  %v5653_v53 = vpop.f32.mrf.mxu1  ;;  %v5633_v39 = vpop.f32.mrf.mxu0 }
 0x11b   : > { %3092 = vmatpush1.bf16.msra.mxu0 %v6221_v32 }
 0x11c   : > { %3093 = vmatprep.subr.bf16.mxu0 %v6229_v4  ;;  %v5655_v5 = vpop.f32.mrf.mxu1  ;;  %v5634_v43 = vpop.f32.mrf.mxu0 }
 0x11d   : > { %3135 = vmatpush1.bf16.msra.mxu1 %v6224_v16 }
 0x11e   : > { %3136 = vmatprep.subr.bf16.mxu1 %v6232_v17  ;;  %v5656_v51 = vpop.f32.mrf.mxu1 }
 0x11f   : > { %3094 = vmatpush1.bf16.msra.mxu0 %v6227_v18  ;;  %v5657_v35 = vadd.f32 %v5656_v51, %v5655_v5 }
 0x120   : > { %3095 = vmatprep.subr.bf16.mxu0 %v6235_v19 }
 0x121   : > { %3137 = vmatpush1.bf16.msra.mxu1 %v6230_v10 }
 0x122   : > { %3138 = vmatprep.subr.bf16.mxu1 %v6238_v22  ;;  %v5632_v22 = vadd.f32 %v5631_v37, %v5630_v33 }
 0x123   : > { %3096 = vmatpush1.bf16.msra.mxu0 %v6233_v24  ;;  %v5654_v24 = vadd.f32 %v5653_v53, %v5652_v52 }
 0x124   : > { %3097 = vmatprep.subr.bf16.mxu0 %v6241_v45 }
 0x125   : > { %3139 = vmatpush1.bf16.msra.mxu1 %v6236_v25 }
 0x126   : > { %3140 = vmatprep.subr.bf16.mxu1 %v6244_v46 }
 0x127   : > { %3098 = vmatpush1.bf16.msra.mxu0 %v6239_v27  ;;  %v724_v27 = vadd.f32 %v5654_v24, %v5632_v22 }
 0x128   : > { %3099 = vmatprep.subr.bf16.mxu0 %v6247_v9 }
 0x129   : > { %3141 = vmatpush1.bf16.msra.mxu1 %v6242_v44  ;;  %v5635_v44 = vadd.f32 %v5634_v43, %v5633_v39 }
 0x12a   : > { %3142 = vmatprep.subr.bf16.mxu1 %v6250_v29 }
 0x12b   : > { %3100 = vmatpush1.bf16.msra.mxu0 %v6245_v47 }
 0x12c   : > { %3101 = vmatprep.subr.bf16.mxu0 %v6253_v20 }
 0x12d   : > { %3143 = vmatpush1.bf16.msra.mxu1 %v6248_v23 }
 0x12e   : > { %3144 = vmatprep.subr.bf16.mxu1 %v6256_v26 }
 0x12f   : > { %3102 = vmatpush1.bf16.msra.mxu0 %v6251_v31 }
 0x130   : > { %3103 = vmatprep.subr.bf16.mxu0 %v6259_v50 }
 0x131   : > { %3145 = vmatpush1.bf16.msra.mxu1 %v6254_v38 }
 0x132   : > { %3146 = vmatprep.subr.bf16.mxu1 %v6262_v57  ;;  %v727_v57 = vadd.f32 %v5657_v35, %v5635_v44 }
 0x133   : > { %3104 = vmatpush1.bf16.msra.mxu0 %v6257_v36 }
 0x134   : > { %3335 = vmatprep.subr.bf16.mxu0 %v6265_v40 }
 0x135   : > { %3147 = vmatpush1.bf16.msra.mxu1 %v6260_v62 }
 0x136   : > { %3378 = vmatprep.subr.bf16.mxu1 %v6268_v3  ;;  %v5674_v54 = vpop.f32.mrf.mxu0 }
 0x138   : > { %v5696_v60 = vpop.f32.mrf.mxu1  ;;  %v5675_v56 = vpop.f32.mrf.mxu0 }
 0x139   : > { %v5676_v45 = vadd.f32 %v5675_v56, %v5674_v54 }
 0x13a   : > { %v5697_v61 = vpop.f32.mrf.mxu1  ;;  %v5677_v58 = vpop.f32.mrf.mxu0 }
 0x13b   : > { %v957_v23 = vadd.f32 %v5676_v45, %v724_v27  ;;  %v5698_v50 = vadd.f32 %v5697_v61, %v5696_v60 }
 0x13c   : > { %v5699_v21 = vpop.f32.mrf.mxu1  ;;  %v5678_v59 = vpop.f32.mrf.mxu0 }
 0x13d   : > { %v5679_v26 = vadd.f32 %v5678_v59, %v5677_v58  ;;  %v998_v33 = vadd.f32 %v5698_v50, %v957_v23 }
 0x13e   : > { %v5700_v63 = vpop.f32.mrf.mxu1 }
 0x13f   : > { %v960_v39 = vadd.f32 %v5679_v26, %v727_v57  ;;  %v5701_v58 = vadd.f32 %v5700_v63, %v5699_v21  ;;  %v6266_v26 = vld [vmem:[#allocation6 + $0xe8] ss:$16 sps:$4 sm:$0xff]   ;;  %v6271_v57 = vld [vmem:[#allocation6 + $0xc4] ss:$16 sps:$4 sm:$0xff]  }
 0x156   : > { %v5718_v0 = vpop.f32.mrf.mxu0 }
 0x158   : > { %v5740_v7 = vpop.f32.mrf.mxu1  ;;  %v5719_v2 = vpop.f32.mrf.mxu0 }
 0x159   : > { %v5720_v9 = vadd.f32 %v5719_v2, %v5718_v0 }
 0x15a   : > { %v5741_v8 = vpop.f32.mrf.mxu1  ;;  %v5721_v6 = vpop.f32.mrf.mxu0 }
 0x15b   : > { %v5742_v29 = vadd.f32 %v5741_v8, %v5740_v7 }
 0x15c   : > { %v5743_v42 = vpop.f32.mrf.mxu1  ;;  %v5722_v12 = vpop.f32.mrf.mxu0 }
 0x15d   : > { %v1362_v36 = vadd.f32 %v5742_v29, %v5720_v9  ;;  %v5723_v62 = vadd.f32 %v5722_v12, %v5721_v6 }
 0x15e   : > { %v5744_v11 = vpop.f32.mrf.mxu1 }
 0x15f   : > { %v5745_v40 = vadd.f32 %v5744_v11, %v5743_v42  ;;  %v1368_v59 = vadd.f32 %v1362_v36, %v998_v33  ;;  %v1001_v42 = vadd.f32 %v5701_v58, %v960_v39  ;;  %v6274_v36 = vld [vmem:[#allocation6 + $0xcc] ss:$16 sps:$4 sm:$0xff]   ;;  %v6295_v58 = vld [vmem:[#allocation6 + $0x44] ss:$16 sps:$4 sm:$0xff]  }
 0x160   : > { %v6280_v33 = vld [vmem:[#allocation6 + $0xac] ss:$16 sps:$4 sm:$0xff]  }
 0x161   : > { %v1365_v7 = vadd.f32 %v5745_v40, %v5723_v62  ;;  %v6269_v62 = vld [vmem:[#allocation6 + $0xc0] ss:$16 sps:$4 sm:$0xff]   ;;  %v6272_v40 = vld [vmem:[#allocation6 + $0xc8] ss:$16 sps:$4 sm:$0xff]   ;;  %v6286_v39 = vld [vmem:[#allocation6 + $0x8c] ss:$16 sps:$4 sm:$0xff]  }
 0x176   : > { %v5762_v28 = vpop.f32.mrf.mxu0 }
 0x178   : > { %v5784_v30 = vpop.f32.mrf.mxu1  ;;  %v5763_v13 = vpop.f32.mrf.mxu0 }
 0x179   : > { %v5764_v31 = vadd.f32 %v5763_v13, %v5762_v28 }
 0x17a   : > { %v5785_v14 = vpop.f32.mrf.mxu1  ;;  %v5765_v15 = vpop.f32.mrf.mxu0 }
 0x17b   : > { %v5786_v38 = vadd.f32 %v5785_v14, %v5784_v30 }
 0x17c   : > { %v5787_v48 = vpop.f32.mrf.mxu1  ;;  %v5766_v49 = vpop.f32.mrf.mxu0 }
 0x17d   : > { %v1744_v5 = vadd.f32 %v5786_v38, %v5764_v31  ;;  %v5767_v43 = vadd.f32 %v5766_v49, %v5765_v15  ;;  %v1369_v49 = vadd.f32 %v1365_v7, %v1001_v42  ;;  %v6293_v7 = vld [vmem:[#allocation6 + $0x40] ss:$16 sps:$4 sm:$0xff]   ;;  %v6307_v42 = vld [vmem:[#allocation6 + $0x4] ss:$16 sps:$4 sm:$0xff]  }
 0x17e   : > { %v5788_v32 = vpop.f32.mrf.mxu1 }
 0x17f   : > { %v5789_v54 = vadd.f32 %v5788_v32, %v5787_v48  ;;  %v1750_v12 = vadd.f32 %v1744_v5, %v1368_v59  ;;  %v6281_v5 = vld [vmem:[#allocation6 + $0x80] ss:$16 sps:$4 sm:$0xff]   ;;  %v6298_v59 = vld [vmem:[#allocation6 + $0x4c] ss:$16 sps:$4 sm:$0xff]  }
 0x181   : > { %v1747_v28 = vadd.f32 %v5789_v54, %v5767_v43  ;;  %v6284_v43 = vld [vmem:[#allocation6 + $0x88] ss:$16 sps:$4 sm:$0xff]   ;;  %v6289_v54 = vld [vmem:[#allocation6 + $0x64] ss:$16 sps:$4 sm:$0xff]  }
 0x196   : > { %v5806_v55 = vpop.f32.mrf.mxu0 }
 0x198   : > { %v5828_v34 = vpop.f32.mrf.mxu1  ;;  %v5807_v16 = vpop.f32.mrf.mxu0 }
 0x199   : > { %v5808_v52 = vadd.f32 %v5807_v16, %v5806_v55  ;;  %v1751_v16 = vadd.f32 %v1747_v28, %v1369_v49  ;;  %v6305_v28 = vld [vmem:[#allocation6] ss:$16 sps:$4 sm:$0xff]   ;;  %v6314_v49 = vld [vmem:[#allocation6 + $0x2e8] ss:$16 sps:$4 sm:$0xff]  }
 0x19a   : > { %v5829_v1 = vpop.f32.mrf.mxu1  ;;  %v5809_v4 = vpop.f32.mrf.mxu0 }
 0x19b   : > { %v5830_v37 = vadd.f32 %v5829_v1, %v5828_v34 }
 0x19c   : > { %v5831_v17 = vpop.f32.mrf.mxu1  ;;  %v5810_v18 = vpop.f32.mrf.mxu0 }
 0x19d   : > { %v2102_v61 = vadd.f32 %v5830_v37, %v5808_v52  ;;  %v5811_v2 = vadd.f32 %v5810_v18, %v5809_v4  ;;  %v6275_v52 = vld [vmem:[#allocation6 + $0xa0] ss:$16 sps:$4 sm:$0xff]   ;;  %v6278_v37 = vld [vmem:[#allocation6 + $0xa8] ss:$16 sps:$4 sm:$0xff]  }
 0x19e   : > { %v5832_v19 = vpop.f32.mrf.mxu1 }
 0x19f   : > { %v5833_v8 = vadd.f32 %v5832_v19, %v5831_v17  ;;  %v2108_v32 = vadd.f32 %v2102_v61, %v1750_v12  ;;  %v5375_v19 = vld [vmem:[%s7178_s2] ss:$0 sm:$0xff]  ;;  %v6301_v61 = vld [vmem:[#allocation6 + $0x24] ss:$16 sps:$4 sm:$0xff]   ;;  %v6310_v12 = vld [vmem:[#allocation6 + $0xc] ss:$16 sps:$4 sm:$0xff]  }
 0x1a1   : > { %v2105_v21 = vadd.f32 %v5833_v8, %v5811_v2  ;;  %v6304_v2 = vld [vmem:[#allocation6 + $0x2c] ss:$16 sps:$4 sm:$0xff]   ;;  %v6299_v8 = vld [vmem:[#allocation6 + $0x20] ss:$16 sps:$4 sm:$0xff]  }
 0x1a3   : > { %v2109_v24 = vadd.f32 %v2105_v21, %v1751_v16  ;;  %v6322_v21 = vld [vmem:[#allocation6 + $0x2cc] ss:$16 sps:$4 sm:$0xff]   ;;  %v6325_v16 = vld [vmem:[#allocation6 + $0x2a4] ss:$16 sps:$4 sm:$0xff]  }
 0x1b6   : > { %v5850_v10 = vpop.f32.mrf.mxu0 }
 0x1b8   : > { %v5872_v25 = vpop.f32.mrf.mxu1  ;;  %v5851_v46 = vpop.f32.mrf.mxu0 }
 0x1b9   : > { %v5852_v51 = vadd.f32 %v5851_v46, %v5850_v10 }
 0x1ba   : > { %v5873_v47 = vpop.f32.mrf.mxu1  ;;  %v5853_v20 = vpop.f32.mrf.mxu0 }
 0x1bb   : > { %v5874_v56 = vadd.f32 %v5873_v47, %v5872_v25 }
 0x1bc   : > { %v5875_v3 = vpop.f32.mrf.mxu1  ;;  %v5854_v53 = vpop.f32.mrf.mxu0 }
 0x1bd   : > { %v2476_v30 = vadd.f32 %v5874_v56, %v5852_v51  ;;  %v5855_v13 = vadd.f32 %v5854_v53, %v5853_v20  ;;  %v6263_v20 = vld [vmem:[#allocation6 + $0xe0] ss:$16 sps:$4 sm:$0xff]   ;;  %v6283_v53 = vld [vmem:[#allocation6 + $0x84] ss:$16 sps:$4 sm:$0xff]   ;;  %v6292_v51 = vld [vmem:[#allocation6 + $0x6c] ss:$16 sps:$4 sm:$0xff]  }
 0x1be   : > { %v5876_v60 = vpop.f32.mrf.mxu1  ;;  %v6287_v56 = vld [vmem:[#allocation6 + $0x60] ss:$16 sps:$4 sm:$0xff]  }
 0x1bf   : > { %v5877_v14 = vadd.f32 %v5876_v60, %v5875_v3  ;;  %v2482_v4 = vadd.f32 %v2476_v30, %v2108_v32  ;;  %v6277_v3 = vld [vmem:[#allocation6 + $0xa4] ss:$16 sps:$4 sm:$0xff]   ;;  %v6296_v60 = vld [vmem:[#allocation6 + $0x48] ss:$16 sps:$4 sm:$0xff]  }
 0x1c0   : > { %v6313_v30 = vld [vmem:[#allocation6 + $0x2e4] ss:$16 sps:$4 sm:$0xff]  }
 0x1c1   : > { %v2479_v17 = vadd.f32 %v5877_v14, %v5855_v13  ;;  %v6316_v13 = vld [vmem:[#allocation6 + $0x2ec] ss:$16 sps:$4 sm:$0xff]   ;;  %v6319_v32 = vld [vmem:[#allocation6 + $0x2c4] ss:$16 sps:$4 sm:$0xff]  }
 0x1c3   : > { %v2483_v46 = vadd.f32 %v2479_v17, %v2109_v24  ;;  %v6326_v17 = vld [vmem:[#allocation6 + $0x2a8] ss:$16 sps:$4 sm:$0xff]   ;;  %v6337_v24 = vld [vmem:[#allocation6 + $0x264] ss:$16 sps:$4 sm:$0xff]  }
 0x1d6   : > { %v5894_v0 = vpop.f32.mrf.mxu0 }
 0x1d8   : > { %v5895_v6 = vpop.f32.mrf.mxu0  ;;  %v5916_v11 = vpop.f32.mrf.mxu1 }
 0x1d9   : > { %v5896_v15 = vadd.f32 %v5895_v6, %v5894_v0  ;;  %v6290_v0 = vld [vmem:[#allocation6 + $0x68] ss:$16 sps:$4 sm:$0xff]  }
 0x1da   : > { %v5897_v48 = vpop.f32.mrf.mxu0  ;;  %v5917_v55 = vpop.f32.mrf.mxu1  ;;  %v6302_v6 = vld [vmem:[#allocation6 + $0x28] ss:$16 sps:$4 sm:$0xff]  }
 0x1db   : > { %v5918_v63 = vadd.f32 %v5917_v55, %v5916_v11  ;;  %v6308_v11 = vld [vmem:[#allocation6 + $0x8] ss:$16 sps:$4 sm:$0xff]  }
 0x1dc   : > { %v5898_v34 = vpop.f32.mrf.mxu0  ;;  %v5919_v1 = vpop.f32.mrf.mxu1 }
 0x1dd   : > { %v2834_v18 = vadd.f32 %v5918_v63, %v5896_v15  ;;  %v5899_v10 = vadd.f32 %v5898_v34, %v5897_v48  ;;  %v6311_v48 = vld [vmem:[#allocation6 + $0x2e0] ss:$16 sps:$4 sm:$0xff]   ;;  %v6320_v34 = vld [vmem:[#allocation6 + $0x2c8] ss:$16 sps:$4 sm:$0xff]  }
 0x1de   : > { %v5920_v22 = vpop.f32.mrf.mxu1  ;;  %v6317_v63 = vld [vmem:[#allocation6 + $0x2c0] ss:$16 sps:$4 sm:$0xff]  }
 0x1df   : > { %v2840_v25 = vadd.f32 %v2834_v18, %v2482_v4  ;;  %v5921_v45 = vadd.f32 %v5920_v22, %v5919_v1  ;;  %v6328_v1 = vld [vmem:[#allocation6 + $0x2ac] ss:$16 sps:$4 sm:$0xff]   ;;  %v6323_v4 = vld [vmem:[#allocation6 + $0x2a0] ss:$16 sps:$4 sm:$0xff]   ;;  %v6331_v18 = vld [vmem:[#allocation6 + $0x284] ss:$16 sps:$4 sm:$0xff]  }
 0x1e0   : > { %v6332_v22 = vld [vmem:[#allocation6 + $0x288] ss:$16 sps:$4 sm:$0xff]  }
 0x1e1   : > { %v2849_v27 = vadd.f32 %v5375_v19, %v2840_v25  ;;  %v2837_v44 = vadd.f32 %v5921_v45, %v5899_v10  ;;  %v6334_v10 = vld [vmem:[#allocation6 + $0x28c] ss:$16 sps:$4 sm:$0xff]   ;;  %v6335_v45 = vld [vmem:[#allocation6 + $0x260] ss:$16 sps:$4 sm:$0xff]  }
 0x1e2   : > { %v6340_v25 = vld [vmem:[#allocation6 + $0x26c] ss:$16 sps:$4 sm:$0xff]  }
 0x1e3   : > { %v2851_v35 = vmax.f32 %v2849_v27, 0.0  ;;  %v2841_v9 = vadd.f32 %v2837_v44, %v2483_v46  ;;  %v6338_v46 = vld [vmem:[#allocation6 + $0x268] ss:$16 sps:$4 sm:$0xff]   ;;  %v6343_v27 = vld [vmem:[#allocation6 + $0x244] ss:$16 sps:$4 sm:$0xff]  }
 0x1e4   : > { %v6346_v44 = vld [vmem:[#allocation6 + $0x24c] ss:$16 sps:$4 sm:$0xff]  }
 0x1e5   : > { %2856 = vst [vmem:[#allocation2 + $0x3] sm:$0xff] %v2851_v35  ;;  %v2850_v29 = vadd.f32 %v5375_v19, %v2841_v9  ;;  %v6329_v19 = vld [vmem:[#allocation6 + $0x280] ss:$16 sps:$4 sm:$0xff]   ;;  %v6344_v9 = vld [vmem:[#allocation6 + $0x248] ss:$16 sps:$4 sm:$0xff]  }
 0x1e7   : > { %v2852_v47 = vmax.f32 %v2850_v29, 0.0  ;;  %v6349_v29 = vld [vmem:[#allocation6 + $0x224] ss:$16 sps:$4 sm:$0xff]  }
 0x1e9   : > { %2857 = vst [vmem:[#allocation2 + $0xb] sm:$0xff] %v2852_v47  ;;  %v7071_v23 = vpack.c.bf16 %v2852_v47, %v2851_v35  ;;  %v6341_v35 = vld [vmem:[#allocation6 + $0x240] ss:$16 sps:$4 sm:$0xff]   ;;  %v6352_v47 = vld [vmem:[#allocation6 + $0x22c] ss:$16 sps:$4 sm:$0xff]  }
 0x1ec   : > { %v2893_v31 = vld [vmem:[#allocation2 + $0x1] sm:$0xff] }
 0x1ed   : > { %v2858_v15 = vld [vmem:[#allocation2] sm:$0xff] }
 0x1f0   : > { %v2894_v38 = vld [vmem:[#allocation2 + $0x9] sm:$0xff] }
 0x1f1   : > { %v2895_v50 = vpack.c.bf16 %v2894_v38, %v2893_v31  ;;  %v2859_v14 = vld [vmem:[#allocation2 + $0x8] sm:$0xff]  ;;  %v6358_v38 = vld [vmem:[#allocation6 + $0x20c] ss:$16 sps:$4 sm:$0xff]  }
 0x1f2   : > { %v2860_v55 = vpack.c.bf16 %v2859_v14, %v2858_v15  ;;  %v6355_v31 = vld [vmem:[#allocation6 + $0x204] ss:$16 sps:$4 sm:$0xff]   ;;  %v6395_v14 = vld [vmem:[#allocation6 + $0x320] ss:$16 sps:$4 sm:$0xff]   ;;  %v6398_v15 = vld [vmem:[#allocation6 + $0x328] ss:$16 sps:$4 sm:$0xff]  }
 0x1f3   : > { %3122 = vmatmul.mubr.bf16.vlgmr.msra.gmra.mxu0 %v2895_v50  ;;  %3165 = vmatmul.mubr.bf16.vlgmr.msra.gmra.mxu1 %v2895_v50  ;;  %v6353_v50 = vld [vmem:[#allocation6 + $0x200] ss:$16 sps:$4 sm:$0xff]  }
 0x1f4   : > { %3336 = vmatpush1.bf16.msra.mxu0 %v6263_v20  ;;  %3379 = vmatpush1.bf16.msra.mxu1 %v6266_v26  ;;  %v6347_v20 = vld [vmem:[#allocation6 + $0x220] ss:$16 sps:$4 sm:$0xff]   ;;  %v6350_v26 = vld [vmem:[#allocation6 + $0x228] ss:$16 sps:$4 sm:$0xff]  }
 0x1f5   : > { %3337 = vmatprep.subr.bf16.mxu0 %v6271_v57  ;;  %3380 = vmatprep.subr.bf16.mxu1 %v6274_v36  ;;  %v6356_v57 = vld [vmem:[#allocation6 + $0x208] ss:$16 sps:$4 sm:$0xff]   ;;  %v6361_v36 = vld [vmem:[#allocation6 + $0x3e4] ss:$16 sps:$4 sm:$0xff]  }
 0x1f6   : > { %3367 = vmatprep.mubr.bf16.mxu0 %v6724_v41  ;;  %3410 = vmatprep.mubr.bf16.mxu1 %v6724_v41 }
 0x1f8   : > { %3338 = vmatpush1.bf16.msra.mxu0 %v6269_v62  ;;  %3381 = vmatpush1.bf16.msra.mxu1 %v6272_v40  ;;  %v6364_v62 = vld [vmem:[#allocation6 + $0x3ec] ss:$16 sps:$4 sm:$0xff]   ;;  %v3422_v40 = vld [vmem:[#allocation2 + $0xa] sm:$0xff] }
 0x1f9   : > { %3339 = vmatprep.subr.bf16.mxu0 %v6277_v3  ;;  %3382 = vmatprep.subr.bf16.mxu1 %v6280_v33  ;;  %v3421_v3 = vld [vmem:[#allocation2 + $0x2] sm:$0xff] }
 0x1fa   : > { %v6359_v33 = vld [vmem:[#allocation6 + $0x3e0] ss:$16 sps:$4 sm:$0xff]  }
 0x1fc   : > { %3340 = vmatpush1.bf16.msra.mxu0 %v6275_v52  ;;  %3383 = vmatpush1.bf16.msra.mxu1 %v6278_v37  ;;  %v6362_v52 = vld [vmem:[#allocation6 + $0x3e8] ss:$16 sps:$4 sm:$0xff]   ;;  %v3423_v37 = vpack.c.bf16 %v3422_v40, %v3421_v3  ;;  %v6449_v40 = vld [vmem:[#allocation6 + $0x400] ss:$16 sps:$4 sm:$0xff]  }
 0x1fd   : > { %3341 = vmatprep.subr.bf16.mxu0 %v6283_v53  ;;  %3384 = vmatprep.subr.bf16.mxu1 %v6286_v39  ;;  %v6367_v53 = vld [vmem:[#allocation6 + $0x3c4] ss:$16 sps:$4 sm:$0xff]   ;;  %v6370_v39 = vld [vmem:[#allocation6 + $0x3cc] ss:$16 sps:$4 sm:$0xff]   ;;  %v6452_v3 = vld [vmem:[#allocation6 + $0x408] ss:$16 sps:$4 sm:$0xff]  }
 0x200   : > { %3342 = vmatpush1.bf16.msra.mxu0 %v6281_v5  ;;  %3385 = vmatpush1.bf16.msra.mxu1 %v6284_v43  ;;  %v6365_v5 = vld [vmem:[#allocation6 + $0x3c0] ss:$16 sps:$4 sm:$0xff]   ;;  %v6368_v43 = vld [vmem:[#allocation6 + $0x3c8] ss:$16 sps:$4 sm:$0xff]  }
 0x201   : > { %3343 = vmatprep.subr.bf16.mxu0 %v6289_v54  ;;  %3386 = vmatprep.subr.bf16.mxu1 %v6292_v51  ;;  %v6373_v54 = vld [vmem:[#allocation6 + $0x3a4] ss:$16 sps:$4 sm:$0xff]   ;;  %v6376_v51 = vld [vmem:[#allocation6 + $0x3ac] ss:$16 sps:$4 sm:$0xff]  }
 0x204   : > { %3344 = vmatpush1.bf16.msra.mxu0 %v6287_v56  ;;  %3387 = vmatpush1.bf16.msra.mxu1 %v6290_v0  ;;  %v6371_v56 = vld [vmem:[#allocation6 + $0x3a0] ss:$16 sps:$4 sm:$0xff]   ;;  %v6374_v0 = vld [vmem:[#allocation6 + $0x3a8] ss:$16 sps:$4 sm:$0xff]  }
 0x205   : > { %3345 = vmatprep.subr.bf16.mxu0 %v6295_v58  ;;  %3388 = vmatprep.subr.bf16.mxu1 %v6298_v59  ;;  %v6379_v58 = vld [vmem:[#allocation6 + $0x384] ss:$16 sps:$4 sm:$0xff]   ;;  %v6382_v59 = vld [vmem:[#allocation6 + $0x38c] ss:$16 sps:$4 sm:$0xff]  }
 0x208   : > { %3346 = vmatpush1.bf16.msra.mxu0 %v6293_v7  ;;  %3389 = vmatpush1.bf16.msra.mxu1 %v6296_v60  ;;  %v6377_v7 = vld [vmem:[#allocation6 + $0x380] ss:$16 sps:$4 sm:$0xff]   ;;  %v6380_v60 = vld [vmem:[#allocation6 + $0x388] ss:$16 sps:$4 sm:$0xff]  }
 0x209   : > { %3347 = vmatprep.subr.bf16.mxu0 %v6301_v61  ;;  %3390 = vmatprep.subr.bf16.mxu1 %v6304_v2  ;;  %v6385_v61 = vld [vmem:[#allocation6 + $0x364] ss:$16 sps:$4 sm:$0xff]   ;;  %v6388_v2 = vld [vmem:[#allocation6 + $0x36c] ss:$16 sps:$4 sm:$0xff]  }
 0x20c   : > { %3348 = vmatpush1.bf16.msra.mxu0 %v6299_v8  ;;  %3391 = vmatpush1.bf16.msra.mxu1 %v6302_v6  ;;  %v6383_v8 = vld [vmem:[#allocation6 + $0x360] ss:$16 sps:$4 sm:$0xff]   ;;  %v6386_v6 = vld [vmem:[#allocation6 + $0x368] ss:$16 sps:$4 sm:$0xff]  }
 0x20d   : > { %3349 = vmatprep.subr.bf16.mxu0 %v6307_v42  ;;  %3392 = vmatprep.subr.bf16.mxu1 %v6310_v12  ;;  %v6391_v42 = vld [vmem:[#allocation6 + $0x344] ss:$16 sps:$4 sm:$0xff]   ;;  %v6394_v12 = vld [vmem:[#allocation6 + $0x34c] ss:$16 sps:$4 sm:$0xff]  }
 0x210   : > { %3350 = vmatpush1.bf16.msra.mxu0 %v6305_v28  ;;  %3393 = vmatpush1.bf16.msra.mxu1 %v6308_v11  ;;  %v6389_v28 = vld [vmem:[#allocation6 + $0x340] ss:$16 sps:$4 sm:$0xff]   ;;  %v6392_v11 = vld [vmem:[#allocation6 + $0x348] ss:$16 sps:$4 sm:$0xff]  }
 0x211   : > { %3617 = vmatprep.subr.bf16.mxu0 %v6313_v30  ;;  %3660 = vmatprep.subr.bf16.mxu1 %v6316_v13  ;;  %v6397_v30 = vld [vmem:[#allocation6 + $0x324] ss:$16 sps:$4 sm:$0xff]   ;;  %v6400_v13 = vld [vmem:[#allocation6 + $0x32c] ss:$16 sps:$4 sm:$0xff]  }
 0x213   : > { %3368 = vmatmul.mubr.bf16.vlgmr.msra.gmra.mxu0 %v2860_v55  ;;  %3411 = vmatmul.mubr.bf16.vlgmr.msra.gmra.mxu1 %v2860_v55  ;;  %v6401_v55 = vld [vmem:[#allocation6 + $0x300] ss:$16 sps:$4 sm:$0xff]  }
 0x214   : > { %3618 = vmatpush1.bf16.msra.mxu0 %v6311_v48  ;;  %3661 = vmatpush1.bf16.msra.mxu1 %v6314_v49  ;;  %v6403_v48 = vld [vmem:[#allocation6 + $0x304] ss:$16 sps:$4 sm:$0xff]   ;;  %v6406_v49 = vld [vmem:[#allocation6 + $0x30c] ss:$16 sps:$4 sm:$0xff]  }
 0x215   : > { %3619 = vmatprep.subr.bf16.mxu0 %v6319_v32  ;;  %3662 = vmatprep.subr.bf16.mxu1 %v6322_v21  ;;  %v6404_v32 = vld [vmem:[#allocation6 + $0x308] ss:$16 sps:$4 sm:$0xff]   ;;  %v6409_v21 = vld [vmem:[#allocation6 + $0x4e4] ss:$16 sps:$4 sm:$0xff]  }
 0x216   : > { %3649 = vmatprep.mubr.bf16.mxu0 %v6724_v41  ;;  %3692 = vmatprep.mubr.bf16.mxu1 %v6724_v41 }
 0x218   : > { %3620 = vmatpush1.bf16.msra.mxu0 %v6317_v63  ;;  %3663 = vmatpush1.bf16.msra.mxu1 %v6320_v34  ;;  %v6412_v63 = vld [vmem:[#allocation6 + $0x4ec] ss:$16 sps:$4 sm:$0xff]   ;;  %v6407_v34 = vld [vmem:[#allocation6 + $0x4e0] ss:$16 sps:$4 sm:$0xff]  }
 0x219   : > { %3621 = vmatprep.subr.bf16.mxu0 %v6325_v16  ;;  %3664 = vmatprep.subr.bf16.mxu1 %v6328_v1  ;;  %v6410_v16 = vld [vmem:[#allocation6 + $0x4e8] ss:$16 sps:$4 sm:$0xff]   ;;  %v6415_v1 = vld [vmem:[#allocation6 + $0x4c4] ss:$16 sps:$4 sm:$0xff]  }
 0x21c   : > { %3622 = vmatpush1.bf16.msra.mxu0 %v6323_v4  ;;  %3665 = vmatpush1.bf16.msra.mxu1 %v6326_v17  ;;  %v6418_v4 = vld [vmem:[#allocation6 + $0x4cc] ss:$16 sps:$4 sm:$0xff]   ;;  %v6413_v17 = vld [vmem:[#allocation6 + $0x4c0] ss:$16 sps:$4 sm:$0xff]  }
 0x21d   : > { %3623 = vmatprep.subr.bf16.mxu0 %v6331_v18  ;;  %3666 = vmatprep.subr.bf16.mxu1 %v6334_v10  ;;  %v6416_v18 = vld [vmem:[#allocation6 + $0x4c8] ss:$16 sps:$4 sm:$0xff]   ;;  %v6421_v10 = vld [vmem:[#allocation6 + $0x4a4] ss:$16 sps:$4 sm:$0xff]  }
 0x220   : > { %3624 = vmatpush1.bf16.msra.mxu0 %v6329_v19  ;;  %3667 = vmatpush1.bf16.msra.mxu1 %v6332_v22  ;;  %v6424_v19 = vld [vmem:[#allocation6 + $0x4ac] ss:$16 sps:$4 sm:$0xff]   ;;  %v6419_v22 = vld [vmem:[#allocation6 + $0x4a0] ss:$16 sps:$4 sm:$0xff]  }
 0x221   : > { %3625 = vmatprep.subr.bf16.mxu0 %v6337_v24  ;;  %3668 = vmatprep.subr.bf16.mxu1 %v6340_v25  ;;  %v6422_v24 = vld [vmem:[#allocation6 + $0x4a8] ss:$16 sps:$4 sm:$0xff]   ;;  %v6427_v25 = vld [vmem:[#allocation6 + $0x484] ss:$16 sps:$4 sm:$0xff]  }
 0x224   : > { %3626 = vmatpush1.bf16.msra.mxu0 %v6335_v45  ;;  %3669 = vmatpush1.bf16.msra.mxu1 %v6338_v46  ;;  %v6425_v45 = vld [vmem:[#allocation6 + $0x480] ss:$16 sps:$4 sm:$0xff]   ;;  %v6428_v46 = vld [vmem:[#allocation6 + $0x488] ss:$16 sps:$4 sm:$0xff]  }
 0x225   : > { %3627 = vmatprep.subr.bf16.mxu0 %v6343_v27  ;;  %3670 = vmatprep.subr.bf16.mxu1 %v6346_v44  ;;  %v6433_v27 = vld [vmem:[#allocation6 + $0x464] ss:$16 sps:$4 sm:$0xff]   ;;  %v6436_v44 = vld [vmem:[#allocation6 + $0x46c] ss:$16 sps:$4 sm:$0xff]  }
 0x228   : > { %3628 = vmatpush1.bf16.msra.mxu0 %v6341_v35  ;;  %3671 = vmatpush1.bf16.msra.mxu1 %v6344_v9  ;;  %v6431_v35 = vld [vmem:[#allocation6 + $0x460] ss:$16 sps:$4 sm:$0xff]   ;;  %v6434_v9 = vld [vmem:[#allocation6 + $0x468] ss:$16 sps:$4 sm:$0xff]  }
 0x229   : > { %3629 = vmatprep.subr.bf16.mxu0 %v6349_v29  ;;  %3672 = vmatprep.subr.bf16.mxu1 %v6352_v47  ;;  %v6439_v29 = vld [vmem:[#allocation6 + $0x444] ss:$16 sps:$4 sm:$0xff]   ;;  %v6442_v47 = vld [vmem:[#allocation6 + $0x44c] ss:$16 sps:$4 sm:$0xff]  }
 0x22c   : > { %3630 = vmatpush1.bf16.msra.mxu0 %v6347_v20  ;;  %3673 = vmatpush1.bf16.msra.mxu1 %v6350_v26  ;;  %v6437_v20 = vld [vmem:[#allocation6 + $0x440] ss:$16 sps:$4 sm:$0xff]   ;;  %v6440_v26 = vld [vmem:[#allocation6 + $0x448] ss:$16 sps:$4 sm:$0xff]  }
 0x22d   : > { %3631 = vmatprep.subr.bf16.mxu0 %v6355_v31  ;;  %3674 = vmatprep.subr.bf16.mxu1 %v6358_v38  ;;  %v6445_v31 = vld [vmem:[#allocation6 + $0x424] ss:$16 sps:$4 sm:$0xff]   ;;  %v6448_v38 = vld [vmem:[#allocation6 + $0x42c] ss:$16 sps:$4 sm:$0xff]  }
 0x230   : > { %3632 = vmatpush1.bf16.msra.mxu0 %v6353_v50  ;;  %3675 = vmatpush1.bf16.msra.mxu1 %v6356_v57  ;;  %v6443_v50 = vld [vmem:[#allocation6 + $0x420] ss:$16 sps:$4 sm:$0xff]   ;;  %v6446_v57 = vld [vmem:[#allocation6 + $0x428] ss:$16 sps:$4 sm:$0xff]  }
 0x231   : > { %3907 = vmatprep.subr.bf16.mxu0 %v6361_v36  ;;  %3950 = vmatprep.subr.bf16.mxu1 %v6364_v62  ;;  %v6451_v36 = vld [vmem:[#allocation6 + $0x404] ss:$16 sps:$4 sm:$0xff]   ;;  %v6454_v62 = vld [vmem:[#allocation6 + $0x40c] ss:$16 sps:$4 sm:$0xff]  }
 0x233   : > { %3650 = vmatmul.mubr.bf16.vlgmr.msra.gmra.mxu0 %v3423_v37  ;;  %3693 = vmatmul.mubr.bf16.vlgmr.msra.gmra.mxu1 %v3423_v37  ;;  %v4001_v37 = vld [vmem:[#allocation2 + $0x4] sm:$0xff] }
 0x234   : > { %3908 = vmatpush1.bf16.msra.mxu0 %v6359_v33  ;;  %3951 = vmatpush1.bf16.msra.mxu1 %v6362_v52  ;;  %v6457_v33 = vld [vmem:[#allocation6 + $0x5e4] ss:$16 sps:$4 sm:$0xff]   ;;  %v6460_v52 = vld [vmem:[#allocation6 + $0x5ec] ss:$16 sps:$4 sm:$0xff]  }
 0x235   : > { %3909 = vmatprep.subr.bf16.mxu0 %v6367_v53  ;;  %3952 = vmatprep.subr.bf16.mxu1 %v6370_v39  ;;  %v4002_v53 = vld [vmem:[#allocation2 + $0xc] sm:$0xff]  ;;  %v6455_v39 = vld [vmem:[#allocation6 + $0x5e0] ss:$16 sps:$4 sm:$0xff]  }
 0x236   : > { %3939 = vmatprep.mubr.bf16.mxu0 %v6724_v41  ;;  %3982 = vmatprep.mubr.bf16.mxu1 %v6724_v41 }
 0x238   : > { %3910 = vmatpush1.bf16.msra.mxu0 %v6365_v5  ;;  %3953 = vmatpush1.bf16.msra.mxu1 %v6368_v43  ;;  %v6458_v5 = vld [vmem:[#allocation6 + $0x5e8] ss:$16 sps:$4 sm:$0xff]   ;;  %v4003_v43 = vpack.c.bf16 %v4002_v53, %v4001_v37  ;;  %v6547_v37 = vld [vmem:[#allocation6 + $0x604] ss:$16 sps:$4 sm:$0xff]   ;;  %v6550_v53 = vld [vmem:[#allocation6 + $0x60c] ss:$16 sps:$4 sm:$0xff]  }
 0x239   : > { %3911 = vmatprep.subr.bf16.mxu0 %v6373_v54  ;;  %3954 = vmatprep.subr.bf16.mxu1 %v6376_v51  ;;  %v6463_v54 = vld [vmem:[#allocation6 + $0x5c4] ss:$16 sps:$4 sm:$0xff]   ;;  %v6466_v51 = vld [vmem:[#allocation6 + $0x5cc] ss:$16 sps:$4 sm:$0xff]  }
 0x23c   : > { %3912 = vmatpush1.bf16.msra.mxu0 %v6371_v56  ;;  %3955 = vmatpush1.bf16.msra.mxu1 %v6374_v0  ;;  %v6461_v56 = vld [vmem:[#allocation6 + $0x5c0] ss:$16 sps:$4 sm:$0xff]   ;;  %v6464_v0 = vld [vmem:[#allocation6 + $0x5c8] ss:$16 sps:$4 sm:$0xff]  }
 0x23d   : > { %3913 = vmatprep.subr.bf16.mxu0 %v6379_v58  ;;  %3956 = vmatprep.subr.bf16.mxu1 %v6382_v59  ;;  %v6469_v58 = vld [vmem:[#allocation6 + $0x5a4] ss:$16 sps:$4 sm:$0xff]   ;;  %v6472_v59 = vld [vmem:[#allocation6 + $0x5ac] ss:$16 sps:$4 sm:$0xff]  }
 0x240   : > { %3914 = vmatpush1.bf16.msra.mxu0 %v6377_v7  ;;  %3957 = vmatpush1.bf16.msra.mxu1 %v6380_v60  ;;  %v6467_v7 = vld [vmem:[#allocation6 + $0x5a0] ss:$16 sps:$4 sm:$0xff]   ;;  %v6470_v60 = vld [vmem:[#allocation6 + $0x5a8] ss:$16 sps:$4 sm:$0xff]  }
 0x241   : > { %3915 = vmatprep.subr.bf16.mxu0 %v6385_v61  ;;  %3958 = vmatprep.subr.bf16.mxu1 %v6388_v2  ;;  %v6475_v61 = vld [vmem:[#allocation6 + $0x584] ss:$16 sps:$4 sm:$0xff]   ;;  %v6478_v2 = vld [vmem:[#allocation6 + $0x58c] ss:$16 sps:$4 sm:$0xff]  }
 0x244   : > { %3916 = vmatpush1.bf16.msra.mxu0 %v6383_v8  ;;  %3959 = vmatpush1.bf16.msra.mxu1 %v6386_v6  ;;  %v6473_v8 = vld [vmem:[#allocation6 + $0x580] ss:$16 sps:$4 sm:$0xff]   ;;  %v6476_v6 = vld [vmem:[#allocation6 + $0x588] ss:$16 sps:$4 sm:$0xff]  }
 0x245   : > { %3917 = vmatprep.subr.bf16.mxu0 %v6391_v42  ;;  %3960 = vmatprep.subr.bf16.mxu1 %v6394_v12  ;;  %v6481_v42 = vld [vmem:[#allocation6 + $0x564] ss:$16 sps:$4 sm:$0xff]   ;;  %v6484_v12 = vld [vmem:[#allocation6 + $0x56c] ss:$16 sps:$4 sm:$0xff]  }
 0x248   : > { %3918 = vmatpush1.bf16.msra.mxu0 %v6389_v28  ;;  %3961 = vmatpush1.bf16.msra.mxu1 %v6392_v11  ;;  %v6479_v28 = vld [vmem:[#allocation6 + $0x560] ss:$16 sps:$4 sm:$0xff]   ;;  %v6482_v11 = vld [vmem:[#allocation6 + $0x568] ss:$16 sps:$4 sm:$0xff]  }
 0x249   : > { %3919 = vmatprep.subr.bf16.mxu0 %v6397_v30  ;;  %3962 = vmatprep.subr.bf16.mxu1 %v6400_v13  ;;  %v6487_v30 = vld [vmem:[#allocation6 + $0x544] ss:$16 sps:$4 sm:$0xff]   ;;  %v6490_v13 = vld [vmem:[#allocation6 + $0x54c] ss:$16 sps:$4 sm:$0xff]  }
 0x24c   : > { %3920 = vmatpush1.bf16.msra.mxu0 %v6395_v14  ;;  %3963 = vmatpush1.bf16.msra.mxu1 %v6398_v15  ;;  %v6485_v14 = vld [vmem:[#allocation6 + $0x540] ss:$16 sps:$4 sm:$0xff]   ;;  %v6488_v15 = vld [vmem:[#allocation6 + $0x548] ss:$16 sps:$4 sm:$0xff]  }
 0x24d   : > { %3921 = vmatprep.subr.bf16.mxu0 %v6403_v48  ;;  %3964 = vmatprep.subr.bf16.mxu1 %v6406_v49  ;;  %v6493_v48 = vld [vmem:[#allocation6 + $0x524] ss:$16 sps:$4 sm:$0xff]   ;;  %v6496_v49 = vld [vmem:[#allocation6 + $0x52c] ss:$16 sps:$4 sm:$0xff]  }
 0x250   : > { %3922 = vmatpush1.bf16.msra.mxu0 %v6401_v55  ;;  %3965 = vmatpush1.bf16.msra.mxu1 %v6404_v32  ;;  %v6491_v55 = vld [vmem:[#allocation6 + $0x520] ss:$16 sps:$4 sm:$0xff]   ;;  %v6494_v32 = vld [vmem:[#allocation6 + $0x528] ss:$16 sps:$4 sm:$0xff]  }
 0x251   : > { %4197 = vmatprep.subr.bf16.mxu0 %v6409_v21  ;;  %4240 = vmatprep.subr.bf16.mxu1 %v6412_v63  ;;  %v6499_v21 = vld [vmem:[#allocation6 + $0x504] ss:$16 sps:$4 sm:$0xff]   ;;  %v6502_v63 = vld [vmem:[#allocation6 + $0x50c] ss:$16 sps:$4 sm:$0xff]  }
 0x253   : > { %3940 = vmatmul.mubr.bf16.vlgmr.msra.gmra.mxu0 %v7071_v23  ;;  %3983 = vmatmul.mubr.bf16.vlgmr.msra.gmra.mxu1 %v7071_v23  ;;  %v6430_v23 = vld [vmem:[#allocation6 + $0x48c] ss:$16 sps:$4 sm:$0xff]  }
 0x254   : > { %4198 = vmatpush1.bf16.msra.mxu0 %v6407_v34  ;;  %4241 = vmatpush1.bf16.msra.mxu1 %v6410_v16  ;;  %v6497_v34 = vld [vmem:[#allocation6 + $0x500] ss:$16 sps:$4 sm:$0xff]   ;;  %v6500_v16 = vld [vmem:[#allocation6 + $0x508] ss:$16 sps:$4 sm:$0xff]  }
 0x255   : > { %4199 = vmatprep.subr.bf16.mxu0 %v6415_v1  ;;  %4242 = vmatprep.subr.bf16.mxu1 %v6418_v4  ;;  %v6505_v1 = vld [vmem:[#allocation6 + $0x6e4] ss:$16 sps:$4 sm:$0xff]   ;;  %v6508_v4 = vld [vmem:[#allocation6 + $0x6ec] ss:$16 sps:$4 sm:$0xff]  }
 0x256   : > { %4229 = vmatprep.mubr.bf16.mxu0 %v6724_v41  ;;  %4272 = vmatprep.mubr.bf16.mxu1 %v6724_v41 }
 0x258   : > { %4200 = vmatpush1.bf16.msra.mxu0 %v6413_v17  ;;  %4243 = vmatpush1.bf16.msra.mxu1 %v6416_v18  ;;  %v4291_v17 = vld [vmem:[#allocation2 + $0x5] sm:$0xff]  ;;  %v4292_v18 = vld [vmem:[#allocation2 + $0xd] sm:$0xff] }
 0x259   : > { %4201 = vmatprep.subr.bf16.mxu0 %v6421_v10  ;;  %4244 = vmatprep.subr.bf16.mxu1 %v6424_v19  ;;  %v6503_v10 = vld [vmem:[#allocation6 + $0x6e0] ss:$16 sps:$4 sm:$0xff]   ;;  %v6506_v19 = vld [vmem:[#allocation6 + $0x6e8] ss:$16 sps:$4 sm:$0xff]  }
 0x25c   : > { %4202 = vmatpush1.bf16.msra.mxu0 %v6419_v22  ;;  %4245 = vmatpush1.bf16.msra.mxu1 %v6422_v24  ;;  %v4293_v22 = vpack.c.bf16 %v4292_v18, %v4291_v17  ;;  %v6511_v24 = vld [vmem:[#allocation6 + $0x6c4] ss:$16 sps:$4 sm:$0xff]  }
 0x25d   : > { %4203 = vmatprep.subr.bf16.mxu0 %v6427_v25  ;;  %4246 = vmatprep.subr.bf16.mxu1 %v6430_v23  ;;  %v6514_v25 = vld [vmem:[#allocation6 + $0x6cc] ss:$16 sps:$4 sm:$0xff]   ;;  %v6509_v23 = vld [vmem:[#allocation6 + $0x6c0] ss:$16 sps:$4 sm:$0xff]  }
 0x260   : > { %4204 = vmatpush1.bf16.msra.mxu0 %v6425_v45  ;;  %4247 = vmatpush1.bf16.msra.mxu1 %v6428_v46  ;;  %v6512_v45 = vld [vmem:[#allocation6 + $0x6c8] ss:$16 sps:$4 sm:$0xff]   ;;  %v6517_v46 = vld [vmem:[#allocation6 + $0x6a4] ss:$16 sps:$4 sm:$0xff]  }
 0x261   : > { %4205 = vmatprep.subr.bf16.mxu0 %v6433_v27  ;;  %4248 = vmatprep.subr.bf16.mxu1 %v6436_v44  ;;  %v6520_v27 = vld [vmem:[#allocation6 + $0x6ac] ss:$16 sps:$4 sm:$0xff]   ;;  %v6515_v44 = vld [vmem:[#allocation6 + $0x6a0] ss:$16 sps:$4 sm:$0xff]  }
 0x264   : > { %4206 = vmatpush1.bf16.msra.mxu0 %v6431_v35  ;;  %4249 = vmatpush1.bf16.msra.mxu1 %v6434_v9  ;;  %v6518_v35 = vld [vmem:[#allocation6 + $0x6a8] ss:$16 sps:$4 sm:$0xff]   ;;  %v6523_v9 = vld [vmem:[#allocation6 + $0x684] ss:$16 sps:$4 sm:$0xff]  }
 0x265   : > { %4207 = vmatprep.subr.bf16.mxu0 %v6439_v29  ;;  %4250 = vmatprep.subr.bf16.mxu1 %v6442_v47  ;;  %v6526_v29 = vld [vmem:[#allocation6 + $0x68c] ss:$16 sps:$4 sm:$0xff]   ;;  %v6521_v47 = vld [vmem:[#allocation6 + $0x680] ss:$16 sps:$4 sm:$0xff]  }
 0x268   : > { %4208 = vmatpush1.bf16.msra.mxu0 %v6437_v20  ;;  %4251 = vmatpush1.bf16.msra.mxu1 %v6440_v26  ;;  %v6524_v20 = vld [vmem:[#allocation6 + $0x688] ss:$16 sps:$4 sm:$0xff]   ;;  %v6529_v26 = vld [vmem:[#allocation6 + $0x664] ss:$16 sps:$4 sm:$0xff]  }
 0x269   : > { %4209 = vmatprep.subr.bf16.mxu0 %v6445_v31  ;;  %4252 = vmatprep.subr.bf16.mxu1 %v6448_v38  ;;  %v6532_v31 = vld [vmem:[#allocation6 + $0x66c] ss:$16 sps:$4 sm:$0xff]   ;;  %v6527_v38 = vld [vmem:[#allocation6 + $0x660] ss:$16 sps:$4 sm:$0xff]  }
 0x26c   : > { %4210 = vmatpush1.bf16.msra.mxu0 %v6443_v50  ;;  %4253 = vmatpush1.bf16.msra.mxu1 %v6446_v57  ;;  %v6535_v50 = vld [vmem:[#allocation6 + $0x644] ss:$16 sps:$4 sm:$0xff]   ;;  %v6538_v57 = vld [vmem:[#allocation6 + $0x64c] ss:$16 sps:$4 sm:$0xff]  }
 0x26d   : > { %4211 = vmatprep.subr.bf16.mxu0 %v6451_v36  ;;  %4254 = vmatprep.subr.bf16.mxu1 %v6454_v62  ;;  %v6533_v36 = vld [vmem:[#allocation6 + $0x640] ss:$16 sps:$4 sm:$0xff]   ;;  %v6536_v62 = vld [vmem:[#allocation6 + $0x648] ss:$16 sps:$4 sm:$0xff]  }
 0x270   : > { %4212 = vmatpush1.bf16.msra.mxu0 %v6449_v40  ;;  %4255 = vmatpush1.bf16.msra.mxu1 %v6452_v3  ;;  %v6541_v40 = vld [vmem:[#allocation6 + $0x624] ss:$16 sps:$4 sm:$0xff]   ;;  %v6544_v3 = vld [vmem:[#allocation6 + $0x62c] ss:$16 sps:$4 sm:$0xff]  }
 0x271   : > { %4487 = vmatprep.subr.bf16.mxu0 %v6457_v33  ;;  %4530 = vmatprep.subr.bf16.mxu1 %v6460_v52  ;;  %v6539_v33 = vld [vmem:[#allocation6 + $0x620] ss:$16 sps:$4 sm:$0xff]   ;;  %v6542_v52 = vld [vmem:[#allocation6 + $0x628] ss:$16 sps:$4 sm:$0xff]  }
 0x273   : > { %4230 = vmatmul.mubr.bf16.vlgmr.msra.gmra.mxu0 %v4003_v43  ;;  %4273 = vmatmul.mubr.bf16.vlgmr.msra.gmra.mxu1 %v4003_v43  ;;  %v4581_v43 = vld [vmem:[#allocation2 + $0x6] sm:$0xff] }
 0x274   : > { %4488 = vmatpush1.bf16.msra.mxu0 %v6455_v39  ;;  %4531 = vmatpush1.bf16.msra.mxu1 %v6458_v5  ;;  %v6545_v39 = vld [vmem:[#allocation6 + $0x600] ss:$16 sps:$4 sm:$0xff]   ;;  %v6548_v5 = vld [vmem:[#allocation6 + $0x608] ss:$16 sps:$4 sm:$0xff]  }
 0x275   : > { %4489 = vmatprep.subr.bf16.mxu0 %v6463_v54  ;;  %4532 = vmatprep.subr.bf16.mxu1 %v6466_v51  ;;  %v4582_v54 = vld [vmem:[#allocation2 + $0xe] sm:$0xff] }
 0x276   : > { %4519 = vmatprep.mubr.bf16.mxu0 %v6724_v41  ;;  %4562 = vmatprep.mubr.bf16.mxu1 %v6724_v41  ;;  %v4583_v51 = vpack.c.bf16 %v4582_v54, %v4581_v43 }
 0x278   : > { %4490 = vmatpush1.bf16.msra.mxu0 %v6461_v56  ;;  %4533 = vmatpush1.bf16.msra.mxu1 %v6464_v0 }
 0x279   : > { %4491 = vmatprep.subr.bf16.mxu0 %v6469_v58  ;;  %4534 = vmatprep.subr.bf16.mxu1 %v6472_v59 }
 0x27c   : > { %4492 = vmatpush1.bf16.msra.mxu0 %v6467_v7  ;;  %4535 = vmatpush1.bf16.msra.mxu1 %v6470_v60 }
 0x27d   : > { %4493 = vmatprep.subr.bf16.mxu0 %v6475_v61  ;;  %4536 = vmatprep.subr.bf16.mxu1 %v6478_v2 }
 0x280   : > { %4494 = vmatpush1.bf16.msra.mxu0 %v6473_v8  ;;  %4537 = vmatpush1.bf16.msra.mxu1 %v6476_v6 }
 0x281   : > { %4495 = vmatprep.subr.bf16.mxu0 %v6481_v42  ;;  %4538 = vmatprep.subr.bf16.mxu1 %v6484_v12 }
 0x284   : > { %4496 = vmatpush1.bf16.msra.mxu0 %v6479_v28  ;;  %4539 = vmatpush1.bf16.msra.mxu1 %v6482_v11 }
 0x285   : > { %4497 = vmatprep.subr.bf16.mxu0 %v6487_v30  ;;  %4540 = vmatprep.subr.bf16.mxu1 %v6490_v13 }
 0x288   : > { %4498 = vmatpush1.bf16.msra.mxu0 %v6485_v14  ;;  %4541 = vmatpush1.bf16.msra.mxu1 %v6488_v15 }
 0x289   : > { %4499 = vmatprep.subr.bf16.mxu0 %v6493_v48  ;;  %4542 = vmatprep.subr.bf16.mxu1 %v6496_v49 }
 0x28c   : > { %4500 = vmatpush1.bf16.msra.mxu0 %v6491_v55  ;;  %4543 = vmatpush1.bf16.msra.mxu1 %v6494_v32 }
 0x28d   : > { %4501 = vmatprep.subr.bf16.mxu0 %v6499_v21  ;;  %4544 = vmatprep.subr.bf16.mxu1 %v6502_v63 }
 0x290   : > { %4502 = vmatpush1.bf16.msra.mxu0 %v6497_v34  ;;  %4545 = vmatpush1.bf16.msra.mxu1 %v6500_v16 }
 0x291   : > { %4777 = vmatprep.subr.bf16.mxu0 %v6505_v1  ;;  %4820 = vmatprep.subr.bf16.mxu1 %v6508_v4 }
 0x293   : > { %4520 = vmatmul.mubr.bf16.vlgmr.msra.gmra.mxu0 %v4293_v22  ;;  %4563 = vmatmul.mubr.bf16.vlgmr.msra.gmra.mxu1 %v4293_v22 }
 0x294   : > { %4778 = vmatpush1.bf16.msra.mxu0 %v6503_v10  ;;  %4821 = vmatpush1.bf16.msra.mxu1 %v6506_v19 }
 0x295   : > { %4779 = vmatprep.subr.bf16.mxu0 %v6511_v24  ;;  %4822 = vmatprep.subr.bf16.mxu1 %v6514_v25 }
 0x296   : > { %4809 = vmatprep.mubr.bf16.mxu0 %v6724_v41  ;;  %4852 = vmatprep.mubr.bf16.mxu1 %v6724_v41  ;;  %v6530_v41 = vld [vmem:[#allocation6 + $0x668] ss:$16 sps:$4 sm:$0xff]  }
 0x298   : > { %4780 = vmatpush1.bf16.msra.mxu0 %v6509_v23  ;;  %4823 = vmatpush1.bf16.msra.mxu1 %v6512_v45 }
 0x299   : > { %4781 = vmatprep.subr.bf16.mxu0 %v6517_v46  ;;  %4824 = vmatprep.subr.bf16.mxu1 %v6520_v27 }
 0x29c   : > { %4782 = vmatpush1.bf16.msra.mxu0 %v6515_v44  ;;  %4825 = vmatpush1.bf16.msra.mxu1 %v6518_v35  ;;  %v4873_v35 = vlaneseq }
 0x29d   : > { %4783 = vmatprep.subr.bf16.mxu0 %v6523_v9  ;;  %4826 = vmatprep.subr.bf16.mxu1 %v6526_v29 }
 0x2a0   : > { %4784 = vmatpush1.bf16.msra.mxu0 %v6521_v47  ;;  %4827 = vmatpush1.bf16.msra.mxu1 %v6524_v20  ;;  %v4874_v47 = vshrl.u32 %v4873_v35, 7 }
 0x2a1   : > { %4785 = vmatprep.subr.bf16.mxu0 %v6529_v26  ;;  %4828 = vmatprep.subr.bf16.mxu1 %v6532_v31 }
 0x2a2   : > { %v4887_v43 = vsub.s32 3, %v4874_v47 }
 0x2a4   : > { %4786 = vmatpush1.bf16.msra.mxu0 %v6527_v38  ;;  %4829 = vmatpush1.bf16.msra.mxu1 %v6530_v41 }
 0x2a5   : > { %4787 = vmatprep.subr.bf16.mxu0 %v6535_v50  ;;  %4830 = vmatprep.subr.bf16.mxu1 %v6538_v57  ;;  %v4875_v50 = vsub.s32 0, %v4874_v47  ;;  %v4883_v57 = vsub.s32 2, %v4874_v47 }
 0x2a8   : > { %4788 = vmatpush1.bf16.msra.mxu0 %v6533_v36  ;;  %4831 = vmatpush1.bf16.msra.mxu1 %v6536_v62 }
 0x2a9   : > { %4789 = vmatprep.subr.bf16.mxu0 %v6541_v40  ;;  %4832 = vmatprep.subr.bf16.mxu1 %v6544_v3 }
 0x2ac   : > { %4790 = vmatpush1.bf16.msra.mxu0 %v6539_v33  ;;  %4833 = vmatpush1.bf16.msra.mxu1 %v6542_v52  ;;  %v4871_v33 = vld [vmem:[%s7180_s4] sm:$0xf] }
 0x2ad   : > { %4791 = vmatprep.subr.bf16.mxu0 %v6547_v37  ;;  %4834 = vmatprep.subr.bf16.mxu1 %v6550_v53 }
 0x2b0   : > { %4792 = vmatpush1.bf16.msra.mxu0 %v6545_v39  ;;  %4835 = vmatpush1.bf16.msra.mxu1 %v6548_v5  ;;  %v4879_v5 = vsub.s32 1, %v4874_v47 }
 0x2b3   : > { %4810 = vmatmul.mubr.bf16.vlgmr.msra.gmra.mxu0 %v4583_v51  ;;  %4853 = vmatmul.mubr.bf16.vlgmr.msra.gmra.mxu1 %v4583_v51  ;;  %v3123_v56 = vpop.f32.mrf.mxu0  ;;  %v3166_v0 = vpop.f32.mrf.mxu1 }
 0x2b5   : > { %v3125_v58 = vpop.f32.mrf.mxu0  ;;  %v3168_v59 = vpop.f32.mrf.mxu1 }
 0x2b7   : > { %v3127_v7 = vpop.f32.mrf.mxu0  ;;  %v3170_v60 = vpop.f32.mrf.mxu1 }
 0x2b9   : > { %v3129_v61 = vpop.f32.mrf.mxu0  ;;  %v3172_v2 = vpop.f32.mrf.mxu1 }
 0x2d3   : > { %v3369_v8 = vpop.f32.mrf.mxu0  ;;  %v3412_v6 = vpop.f32.mrf.mxu1 }
 0x2d4   : > { %v3370_v31 = vadd.f32 %v3369_v8, %v3123_v56  ;;  %v3413_v38 = vadd.f32 %v3412_v6, %v3166_v0 }
 0x2d5   : > { %v3371_v42 = vpop.f32.mrf.mxu0  ;;  %v3414_v12 = vpop.f32.mrf.mxu1 }
 0x2d6   : > { %v3372_v41 = vadd.f32 %v3371_v42, %v3125_v58  ;;  %v3415_v36 = vadd.f32 %v3414_v12, %v3168_v59  ;;  %v4876_v59 = vrot.slane %v4871_v33, %v4875_v50 }
 0x2d7   : > { %v3373_v28 = vpop.f32.mrf.mxu0  ;;  %v3416_v11 = vpop.f32.mrf.mxu1 }
 0x2d8   : > { %v3374_v62 = vadd.f32 %v3373_v28, %v3127_v7  ;;  %v3417_v52 = vadd.f32 %v3416_v11, %v3170_v60  ;;  %v4884_v7 = vrot.slane %v4871_v33, %v4883_v57  ;;  %v4880_v11 = vrot.slane %v4871_v33, %v4879_v5 }
 0x2d9   : > { %v3375_v30 = vpop.f32.mrf.mxu0  ;;  %v3418_v13 = vpop.f32.mrf.mxu1 }
 0x2da   : > { %v3376_v37 = vadd.f32 %v3375_v30, %v3129_v61  ;;  %v3419_v58 = vadd.f32 %v3418_v13, %v3172_v2  ;;  %v4888_v30 = vrot.slane %v4871_v33, %v4887_v43 }
 0x2f3   : > { %v3651_v14 = vpop.f32.mrf.mxu0  ;;  %v3694_v15 = vpop.f32.mrf.mxu1 }
 0x2f4   : > { %v3703_v40 = vadd.f32 %v3651_v14, %v3370_v31  ;;  %v3705_v3 = vadd.f32 %v3694_v15, %v3413_v38 }
 0x2f5   : > { %v3653_v48 = vpop.f32.mrf.mxu0  ;;  %v3696_v49 = vpop.f32.mrf.mxu1 }
 0x2f6   : > { %v3704_v54 = vadd.f32 %v3653_v48, %v3372_v41  ;;  %v3706_v51 = vadd.f32 %v3696_v49, %v3415_v36 }
 0x2f7   : > { %v3655_v55 = vpop.f32.mrf.mxu0  ;;  %v3698_v32 = vpop.f32.mrf.mxu1 }
 0x2f8   : > { %v3707_v8 = vadd.f32 %v3655_v55, %v3374_v62  ;;  %v3709_v14 = vadd.f32 %v3698_v32, %v3417_v52 }
 0x2f9   : > { %v3657_v21 = vpop.f32.mrf.mxu0  ;;  %v3700_v63 = vpop.f32.mrf.mxu1 }
 0x2fa   : > { %v3708_v15 = vadd.f32 %v3657_v21, %v3376_v37 }
 0x313   : > { %v3941_v34 = vpop.f32.mrf.mxu0  ;;  %v3984_v16 = vpop.f32.mrf.mxu1 }
 0x314   : > { %v3993_v56 = vadd.f32 %v3941_v34, %v3703_v40  ;;  %v3995_v0 = vadd.f32 %v3984_v16, %v3705_v3  ;;  %v3710_v34 = vadd.f32 %v3700_v63, %v3419_v58 }
 0x315   : > { %v3943_v1 = vpop.f32.mrf.mxu0  ;;  %v3986_v4 = vpop.f32.mrf.mxu1 }
 0x316   : > { %v3994_v6 = vadd.f32 %v3943_v1, %v3704_v54  ;;  %v3996_v42 = vadd.f32 %v3986_v4, %v3706_v51 }
 0x317   : > { %v3945_v17 = vpop.f32.mrf.mxu0  ;;  %v3988_v18 = vpop.f32.mrf.mxu1 }
 0x318   : > { %v3997_v16 = vadd.f32 %v3945_v17, %v3707_v8  ;;  %v3999_v2 = vadd.f32 %v3988_v18, %v3709_v14 }
 0x319   : > { %v3947_v10 = vpop.f32.mrf.mxu0  ;;  %v7087_v19 = vpop.f32.mrf.mxu1 }
 0x31a   : > { %v3998_v13 = vadd.f32 %v3947_v10, %v3708_v15  ;;  %v4000_v32 = vadd.f32 %v7087_v19, %v3710_v34 }
 0x333   : > { %v4231_v22 = vpop.f32.mrf.mxu0  ;;  %v4274_v24 = vpop.f32.mrf.mxu1 }
 0x334   : > { %v4283_v12 = vadd.f32 %v4231_v22, %v3993_v56  ;;  %v4285_v28 = vadd.f32 %v4274_v24, %v3995_v0 }
 0x335   : > { %v4233_v25 = vpop.f32.mrf.mxu0  ;;  %v4276_v23 = vpop.f32.mrf.mxu1 }
 0x336   : > { %v4284_v35 = vadd.f32 %v4233_v25, %v3994_v6  ;;  %v4286_v47 = vadd.f32 %v4276_v23, %v3996_v42 }
 0x337   : > { %v4235_v45 = vpop.f32.mrf.mxu0  ;;  %v4278_v46 = vpop.f32.mrf.mxu1 }
 0x338   : > { %v4287_v21 = vadd.f32 %v4235_v45, %v3997_v16  ;;  %v4289_v38 = vadd.f32 %v4278_v46, %v3999_v2 }
 0x339   : > { %v4237_v27 = vpop.f32.mrf.mxu0  ;;  %v7089_v44 = vpop.f32.mrf.mxu1 }
 0x33a   : > { %v4288_v41 = vadd.f32 %v4237_v27, %v3998_v13  ;;  %v4290_v17 = vadd.f32 %v7089_v44, %v4000_v32 }
 0x353   : > { %v4521_v9 = vpop.f32.mrf.mxu0  ;;  %v4564_v29 = vpop.f32.mrf.mxu1 }
 0x354   : > { %v4573_v48 = vadd.f32 %v4521_v9, %v4283_v12  ;;  %v4575_v49 = vadd.f32 %v4564_v29, %v4285_v28 }
 0x355   : > { %v4523_v20 = vpop.f32.mrf.mxu0  ;;  %v4566_v26 = vpop.f32.mrf.mxu1 }
 0x356   : > { %v4574_v1 = vadd.f32 %v4523_v20, %v4284_v35  ;;  %v4576_v4 = vadd.f32 %v4566_v26, %v4286_v47 }
 0x357   : > { %v4525_v53 = vpop.f32.mrf.mxu0  ;;  %v4568_v39 = vpop.f32.mrf.mxu1 }
 0x358   : > { %v4577_v18 = vadd.f32 %v4525_v53, %v4287_v21  ;;  %v4579_v10 = vadd.f32 %v4568_v39, %v4289_v38  ;;  %v6585_v38 = vld [vmem:[%s6852_s9 + $0x8] sm:$0xff] }
 0x359   : > { %v4527_v60 = vpop.f32.mrf.mxu0  ;;  %v4570_v61 = vpop.f32.mrf.mxu1 }
 0x35a   : > { %v4578_v57 = vadd.f32 %v4527_v60, %v4288_v41  ;;  %v4580_v45 = vadd.f32 %v4570_v61, %v4290_v17 }
 0x373   : > { %v4811_v55 = vpop.f32.mrf.mxu0  ;;  %v4854_v31 = vpop.f32.mrf.mxu1 }
 0x374   : > { %v4863_v22 = vadd.f32 %v4811_v55, %v4573_v48  ;;  %v4865_v24 = vadd.f32 %v4854_v31, %v4575_v49  ;;  %v6583_v31 = vld [vmem:[%s6852_s9] sm:$0xff] }
 0x375   : > { %v4813_v50 = vpop.f32.mrf.mxu0  ;;  %v4856_v25 = vpop.f32.mrf.mxu1 }
 0x376   : > { %v4893_v23 = vadd.f32 %v4876_v59, %v4863_v22  ;;  %v4895_v9 = vadd.f32 %v4884_v7, %v4865_v24  ;;  %v4864_v29 = vadd.f32 %v4813_v50, %v4574_v1  ;;  %v4866_v63 = vadd.f32 %v4856_v25, %v4576_v4  ;;  %v6584_v22 = vld [vmem:[%s6852_s9 + $0x10] sm:$0xff] }
 0x377   : > { %v4815_v20 = vpop.f32.mrf.mxu0  ;;  %v4858_v26 = vpop.f32.mrf.mxu1 }
 0x378   : > { %v5600_v36 = vmul.f32 -1.442695, %v4893_v23  ;;  %v5602_v62 = vmul.f32 -1.442695, %v4895_v9  ;;  %v4894_v40 = vadd.f32 %v4880_v11, %v4864_v29  ;;  %v4896_v19 = vadd.f32 %v4888_v30, %v4866_v63  ;;  %v6586_v63 = vld [vmem:[%s6852_s9 + $0x18] sm:$0xff] }
 0x379   : > { %v4867_v46 = vadd.f32 %v4815_v20, %v4577_v18  ;;  %v4869_v27 = vadd.f32 %v4858_v26, %v4579_v10  ;;  %v4817_v3 = vpop.f32.mrf.mxu0  ;;  %v4860_v33 = vpop.f32.mrf.mxu1  ;;  %v6587_v26 = vld [vmem:[%s6852_s9 + $0x40] sm:$0x3f] }
 0x37a   : > { %6551 = vpow2.f32 %v5600_v36  ;;  %v5601_v52 = vmul.f32 -1.442695, %v4894_v40  ;;  %v5603_v37 = vmul.f32 -1.442695, %v4896_v19  ;;  %v4868_v5 = vadd.f32 %v4817_v3, %v4578_v57  ;;  %v6588_v40 = vld [vmem:[%s6852_s9 + $0x20] sm:$0xff] }
 0x37b   : > { %6553 = vpow2.f32 %v5602_v62  ;;  %v4897_v44 = vadd.f32 %v4876_v59, %v4867_v46  ;;  %v4899_v53 = vadd.f32 %v4884_v7, %v4869_v27  ;;  %v4870_v39 = vadd.f32 %v4860_v33, %v4580_v45  ;;  %v6589_v46 = vld [vmem:[%s6852_s9 + $0x50] sm:$0x3f] }
 0x37c   : > { %6555 = vpow2.f32 %v5601_v52  ;;  %v4898_v43 = vadd.f32 %v4880_v11, %v4868_v5  ;;  %v6590_v52 = vld [vmem:[%s6852_s9 + $0x30] sm:$0xff] }
 0x37d   : > { %6557 = vpow2.f32 %v5603_v37  ;;  %v5604_v54 = vmul.f32 -1.442695, %v4897_v44  ;;  %v5606_v51 = vmul.f32 -1.442695, %v4899_v53  ;;  %v4900_v56 = vadd.f32 %v4888_v30, %v4870_v39  ;;  %v6591_v44 = vld [vmem:[%s6852_s9 + $0x48] sm:$0x3f] }
 0x37e   : > { %v5605_v0 = vmul.f32 -1.442695, %v4898_v43 }
 0x37f   : > { %6559 = vpow2.f32 %v5604_v54  ;;  %v5607_v58 = vmul.f32 -1.442695, %v4900_v56  ;;  %v6592_v54 = vld [vmem:[%s6852_s9 + $0x28] sm:$0xff] }
 0x380   : > { %6561 = vpow2.f32 %v5606_v51 }
 0x381   : > { %6563 = vpow2.f32 %v5605_v0 }
 0x382   : > { %6565 = vpow2.f32 %v5607_v58 }
 0x387   : > { %v6552_v8 = vpop.eup %6551 }
 0x388   : > { %v6554_v6 = vpop.eup %6553  ;;  %v4925_v42 = vadd.f32 1.0, %v6552_v8  ;;  %v6593_v8 = vld [vmem:[%s6852_s9 + $0x38] sm:$0xff] }
 0x389   : > { %v6556_v12 = vpop.eup %6555  ;;  %v4927_v28 = vadd.f32 1.0, %v6554_v6 }
 0x38a   : > { %v6558_v59 = vpop.eup %6557  ;;  %6567 = vrcp.f32 %v4925_v42  ;;  %v4926_v7 = vadd.f32 1.0, %v6556_v12  ;;  %v6594_v42 = vld [vmem:[%s6852_s9 + $0x58] sm:$0x3f]  ;;  %s6653_s9 = scalar_lea.vmem %s6652_s8, 2048 }
 0x38b   : > { %6569 = vrcp.f32 %v4927_v28  ;;  %v4928_v14 = vadd.f32 1.0, %v6558_v59  ;;  %p6655_p0 = scmp.lt.s32.totalorder %s6653_s9, %s6647_s6 }
 0x38c   : > { %v6560_v15 = vpop.eup %6559  ;;  %6571 = vrcp.f32 %v4926_v7 }
 0x38d   : > { %v6562_v60 = vpop.eup %6561  ;;  %6573 = vrcp.f32 %v4928_v14  ;;  %v4929_v61 = vadd.f32 1.0, %v6560_v15  ;;  %p6656_p1 = por %p6655_p0, %p6654_p11 }
 0x38e   : > { %v6564_v11 = vpop.eup %6563  ;;  %v4931_v30 = vadd.f32 1.0, %v6562_v60 }
 0x38f   : > { %v6566_v35 = vpop.eup %6565  ;;  %6575 = vrcp.f32 %v4929_v61  ;;  %v4930_v47 = vadd.f32 1.0, %v6564_v11  ;;  %p6657_p3 = pnand %p6656_p1, %p6650_p8 }
 0x390   : > { %6577 = vrcp.f32 %v4931_v30  ;;  %v4932_v48 = vadd.f32 1.0, %v6566_v35 }
 0x391   : > { %6579 = vrcp.f32 %v4930_v47 }
 0x392   : > { %6581 = vrcp.f32 %v4932_v48 }
 0x397   : > { %v6568_v49 = vpop.eup %6567 }
 0x398   : > { %v6570_v34 = vpop.eup %6569  ;;  %v4958_v16 = vrot.slane %v6568_v49, 5 }
 0x399   : > { %v6572_v2 = vpop.eup %6571  ;;  %v4960_v13 = vrot.slane %v6570_v34, 5 }
 0x39a   : > { %v6574_v55 = vpop.eup %6573  ;;  %v4982_v1 = vmul.f32 %v6583_v31, %v4958_v16  ;;  %v4959_v4 = vrot.slane %v6572_v2, 5 }
 0x39b   : > { %v4984_v24 = vmul.f32 %v6584_v22, %v4960_v13  ;;  %v4961_v32 = vrot.slane %v6574_v55, 5 }
 0x39c   : > { %v6576_v21 = vpop.eup %6575  ;;  %v4983_v41 = vmul.f32 %v6585_v38, %v4959_v4  ;;  %v5007_v9 = vrot.slane %v4982_v1, 3 }
 0x39d   : > { %v6578_v50 = vpop.eup %6577  ;;  %v4962_v25 = vrot.slane %v6576_v21, 5  ;;  %v5013_v29 = vrot.slane %v4984_v24, 3  ;;  %v4985_v17 = vmul.f32 %v6586_v63, %v4961_v32 }
 0x39e   : > { %v6580_v23 = vpop.eup %6579  ;;  %v4966_v18 = vrot.slane %v6578_v50, 5  ;;  %v5010_v57 = vrot.slane %v4983_v41, 3 }
 0x39f   : > { %v6582_v10 = vpop.eup %6581  ;;  %v4963_v20 = vsel %vm4957_vm6, %v4958_v16, %v4962_v25  ;;  %v4990_v36 = vmul.f32 %v6587_v26, %v4962_v25  ;;  %v4964_v62 = vrot.slane %v6580_v23, 5  ;;  %v5016_v28 = vrot.slane %v4985_v17, 3 }
 0x3a0   : > { %v4986_v19 = vmul.f32 %v6588_v40, %v4963_v20  ;;  %v4967_v45 = vsel %vm4957_vm6, %v4960_v13, %v4966_v18  ;;  %v4992_v27 = vmul.f32 %v6589_v46, %v4966_v18  ;;  %v4968_v3 = vrot.slane %v6582_v10, 5 }
 0x3a1   : > { %v5019_v33 = vrot.slane %v4990_v36, 3  ;;  %v4988_v37 = vmul.f32 %v6590_v52, %v4967_v45  ;;  %v4965_v5 = vsel %vm4957_vm6, %v4959_v4, %v4964_v62  ;;  %v4991_v53 = vmul.f32 %v6591_v44, %v4964_v62 }
 0x3a2   : > { %v5008_v39 = vrot.slane %v4986_v19, 3  ;;  %v5023_v43 = vrot.slane %v4992_v27, 3  ;;  %v4987_v51 = vmul.f32 %v6592_v54, %v4965_v5  ;;  %v4969_v56 = vsel %vm4957_vm6, %v4961_v32, %v4968_v3 }
 0x3a3   : > { %v5014_v0 = vrot.slane %v4988_v37, 3  ;;  %v5021_v58 = vrot.slane %v4991_v53, 3  ;;  %v4989_v6 = vmul.f32 %v6593_v8, %v4969_v56  ;;  %v4993_v12 = vmul.f32 %v6594_v42, %v4968_v3 }
 0x3a4   : > { %v5009_v59 = vsel %vm2549_vm4, %v5007_v9, %v5008_v39  ;;  %v5020_v7 = vsel %vm2549_vm4, %v5008_v39, %v5019_v33  ;;  %v5011_v14 = vrot.slane %v4987_v51, 3 }
 0x3a5   : > { %5035 = vst [vmem:[%s247_s17] sm:$0xff] %v5009_v59  ;;  %5039 = vst [vmem:[%s247_s17 + $0x20] sm:$0xff] %v5020_v7  ;;  %v5015_v15 = vsel %vm2549_vm4, %v5013_v29, %v5014_v0  ;;  %v5024_v60 = vsel %vm2549_vm4, %v5014_v0, %v5023_v43  ;;  %v5017_v61 = vrot.slane %v4989_v6, 3  ;;  %v5025_v11 = vrot.slane %v4993_v12, 3 }
 0x3a6   : > { %5037 = vst [vmem:[%s247_s17 + $0x10] sm:$0xff] %v5015_v15  ;;  %5041 = vst [vmem:[%s247_s17 + $0x30] sm:$0xff] %v5024_v60  ;;  %v5012_v30 = vsel %vm2549_vm4, %v5010_v57, %v5011_v14  ;;  %v5022_v35 = vsel %vm2549_vm4, %v5011_v14, %v5021_v58 }
 0x3a7   : > { %5036 = vst [vmem:[%s247_s17 + $0x8] sm:$0xff] %v5012_v30  ;;  %5040 = vst [vmem:[%s247_s17 + $0x28] sm:$0xff] %v5022_v35  ;;  %v5018_v47 = vsel %vm2549_vm4, %v5016_v28, %v5017_v61  ;;  %v5026_v48 = vsel %vm2549_vm4, %v5017_v61, %v5025_v11 }
 0x3a8   : > { %5038 = vst [vmem:[%s247_s17 + $0x18] sm:$0xff] %v5018_v47  ;;  %5042 = vst [vmem:[%s247_s17 + $0x38] sm:$0xff] %v5026_v48 }
 0x3a9   : > { %6660 = shalt.err (!%p6657_p3)
}
 0x3aa   : > { %s6661_s10 = scalar_lea.hbm %s7126_s26, 1024  ;;  %s6665_s13 = scalar_lea.hbm %s7181_s5, 2048 }
 0x3ab   : > { %p6662_p2 = scmp.ne.s32.totalorder %s7126_s26, %s6661_s10  ;;  %p6666_p6 = scmp.lt.s32.totalorder %s7126_s26, %s7181_s5 }
 0x3ac   : > { %p6667_p9 = scmp.lt.s32.totalorder %s6665_s13, %s6661_s10 }
 0x3ad   : > { %p6663_p4 = pnand %p6662_p2, %p6796_p5 }
 0x3ae   : > { %p6668_p10 = por %p6667_p9, %p6666_p6 }
 0x3af   : > { %p6664_p13 = pneg %p6663_p4 }
 0x3b1   : > { %p6669_p12 = pnand %p6668_p10, %p6664_p13 }
 0x3b3   : > { %6672 = shalt.err (!%p6669_p12)
}
 0x3b4   : > { %s6726_s16 = smov 512   ;;  %s6727_s17 = smov 32  }
 0x3b5   : > { %5931 = dma.vmem_to_hbm [thread:$0]  (%p6796_p5), %s7128_s23, 1024, %s7126_s26, %s7136_s30, %s6726_s16, %s6726_s16, %s6727_s17  }
 0x3b6 PF: > { %p5948_p7 = scmp.ge.s32.totalorder %s6715_s21, 2  ;;  %s5072_s22 = sand.u32 1, %s6703_s18  }
 0x3b7   : > { %p7191_p8 = scmp.ne.s32.totalorder %s7184_s29, 0  ;;  %s5073_s25 = scalar_lea.sflag [#allocation5], %s5072_s22 }
 0x3b9   : > { %p5941_p11 = pnand %p5948_p7, %p7191_p8 }
 0x3bb   : > { %p5942_p0 = pneg %p5941_p11 }
 0x3bd   : > { %6698 = dma.done.wait (%p5942_p0), %s5073_s25, 1024  }
 0x3be   : > { %6700 = vsyncadd (%p5942_p0), %s5073_s25, 4294966272  ;;  %p17_p1 = scmp.ge.s32.totalorder %s6783_s24, 4   ;;  %s7192_s18 = smov %s6707_s19 }
 0x3bf   : > { %s7193_s19 = smov %s6711_s20  ;;  %s7194_s20 = smov %s6794_s27 }
 0x3c0   : > { %s7195_s21 = smov %s6783_s24  ;;  %19 = sbr.rel (!%p17_p1) target bundleno = 5 (0x5), region = 96 }
 0x3c5   :  { %5078 = vsyncpa [#allocation4], 1 }
 0x3c6   :  { %5080 = vsyncpa [#allocation4 + $0x1], 1 }
 0x3c7   :  { %5081 = vsyncpa [#allocation7], 1 }
 0x3c8   :  { %5082 = vsyncpa [#allocation5], 1 }
 0x3c9   :  { %5084 = vsyncpa [#allocation5 + $0x1], 1 }

</bundles_post_ra>
